<compile_context>
chip_gen: v7x
topology: tpu7x:2x2x1
jax: 0.10.0
libtpu: 0.0.40
codegen_flags: <defaults>
</compile_context>

<pallas_src>
import jax
import jax.numpy as jnp
from jax import lax
from jax.experimental import pallas as pl
from jax.experimental.pallas import tpu as pltpu


def _make_gru_kernel(num_cells, time_block, hidden_size, matmul_dtype):
    """Builds the Pallas kernel closed over static layer count / chunk size."""
    L, Tt, H = num_cells, time_block, hidden_size

    def kernel(*refs):
        # refs layout:
        #   [0]  gx0_ref   (Tt, Bb, 3H)  precomputed layer-0 x-projection (+bias), f32
        #   [1]  h0_ref    (L, Bb, H)
        #   layer 0:        Wh_ur (H,2H), Wh_n (H,H)
        #   layer l>=1:     Wx (H,3H), b (1,3H), Wh_ur (H,2H), Wh_n (H,H)
        #   [-2] out_ref   (Tt, Bb, H)
        #   [-1] h_scr     VMEM (L, Bb, H), persists across time chunks
        gx0_ref = refs[0]
        h0_ref = refs[1]
        idx = 2
        layer_refs = [(None, None, refs[idx], refs[idx + 1])]
        idx += 2
        for _ in range(1, L):
            layer_refs.append((refs[idx], refs[idx + 1], refs[idx + 2], refs[idx + 3]))
            idx += 4
        out_ref = refs[idx]
        h_scr = refs[idx + 1]

        Bb = out_ref.shape[1]
        t_chunk = pl.program_id(1)  # time axis is the last (sequential) grid dim

        @pl.when(t_chunk == 0)
        def _():
            h_scr[...] = h0_ref[...]

        # Hoist weight loads and bias broadcasts out of the unrolled time loop
        # (JAX does not CSE broadcast_in_dim inside unrolled loops).
        loaded = []
        for l in range(L):
            wx_ref, b_ref, whur_ref, whn_ref = layer_refs[l]
            wx = None if wx_ref is None else wx_ref[...]
            b = None if b_ref is None else jnp.broadcast_to(b_ref[...], (Bb, 3 * H))
            loaded.append((wx, b, whur_ref[...], whn_ref[...]))

        # Hidden states carried in registers within the chunk.
        h_init = tuple(h_scr[l] for l in range(L))

        def step(i, hs):
            hs = list(hs)
            xt = None
            ht = None
            for l in range(L):
                wx, b, whur, whn = loaded[l]
                h_prev = hs[l]
                if l == 0:
                    gx = gx0_ref[i]  # (Bb, 3H), bias already folded in, f32
                else:
                    gx = jnp.dot(xt.astype(matmul_dtype), wx,
                                 preferred_element_type=jnp.float32) + b
                gh = jnp.dot(h_prev.astype(matmul_dtype), whur,
                             preferred_element_type=jnp.float32)  # (Bb, 2H)
                # Gate naming mirrors the reference: rt <- update_gate, zt <- reset_gate.
                rt = jax.nn.sigmoid(gx[:, :H] + gh[:, :H])
                zt = jax.nn.sigmoid(gx[:, H:2 * H] + gh[:, H:])
                gn = jnp.dot((rt * h_prev).astype(matmul_dtype), whn,
                             preferred_element_type=jnp.float32)
                nt = jnp.tanh(gx[:, 2 * H:] + gn)
                ht = (1.0 - zt) * nt + zt * h_prev
                xt = ht
                hs[l] = ht
            out_ref[i] = ht.astype(out_ref.dtype)
            return tuple(hs)

        h_final = lax.fori_loop(0, Tt, step, h_init, unroll=True)

        # Persist the carried hidden state for the next time chunk.
        for l in range(L):
            h_scr[l] = h_final[l]

    return kernel


def gru_pallas(x, h0, params, *, time_block=None, batch_block=None,
               use_bf16_matmul=False):
    """GRU forward.

    Args:
      x:  (B, T, E)  float32  (PyTorch layout)
      h0: (L, B, H)  float32  (PyTorch layout)
      params: list of length L; each entry is a dict with keys
        'Wu','bu','Wr','br','Wn','bn' where W* has nn.Linear shape
        (H, in_features) and b* has shape (H,).
      time_block: timesteps per grid step (default: all of T in one step).
      batch_block: batch rows per grid step along a "parallel" axis (default:
        all of B). Only useful on multi-TensorCore chips with large B
        (keep it a multiple of 8 for sublane granularity).
      use_bf16_matmul: cast weights + matmul inputs to bf16 (f32 accumulation,
        f32 elementwise) — recommended on v6e/v7x.

    Returns:
      hidden_states: (B, T, H)
      ht:            (B, 1, H)
    """
    B, T, E = x.shape
    L, _, H = h0.shape
    assert L == len(params)

    Tt = T if time_block is None else time_block
    Bb = B if batch_block is None else batch_block
    assert T % Tt == 0, "time_block must divide T"
    assert B % Bb == 0, "batch_block must divide B"

    mm_dtype = jnp.bfloat16 if use_bf16_matmul else jnp.float32

    x_tm = jnp.transpose(x, (1, 0, 2))  # (T, B, E) time-major

    # Split each nn.Linear weight into x-part / h-part and fuse the gates:
    #   Wx_all: (in_x, 3H) [u|r|n], Wh_ur: (H, 2H) [u|r], Wh_n: (H, H), b: (1, 3H)
    fused = []
    for l, p in enumerate(params):
        in_x = E if l == 0 else H
        wxs, whs, bs = [], [], []
        for gate in ("u", "r", "n"):
            W = p["W" + gate]                      # (H, in_x + H)
            wxs.append(jnp.transpose(W[:, :in_x]))  # (in_x, H)
            whs.append(jnp.transpose(W[:, in_x:]))  # (H, H)
            bs.append(p["b" + gate])
        fused.append((jnp.concatenate(wxs, axis=1),          # (in_x, 3H)
                      jnp.concatenate(whs[:2], axis=1),       # (H, 2H)
                      whs[2],                                  # (H, H)
                      jnp.concatenate(bs).reshape(1, 3 * H)))  # (1, 3H)

    # Hoist the layer-0 input projections out of the recurrence: one big
    # (T*B, E) x (E, 3H) matmul (bias folded in), done in plain XLA.
    wx0, whur0, whn0, b0 = fused[0]
    gx0 = (jnp.dot(x_tm.reshape(T * B, E).astype(mm_dtype), wx0.astype(mm_dtype),
                   preferred_element_type=jnp.float32)
           .reshape(T, B, 3 * H) + b0)

    # Whole-array, VMEM-resident (single-buffered) weight operands.
    flat_weights = [whur0.astype(mm_dtype), whn0.astype(mm_dtype)]
    for l in range(1, L):
        wx, whur, whn, b = fused[l]
        flat_weights += [wx.astype(mm_dtype), b,
                         whur.astype(mm_dtype), whn.astype(mm_dtype)]

    vmem_full = pl.BlockSpec(memory_space=pltpu.MemorySpace.VMEM)
    in_specs = [
        pl.BlockSpec((Tt, Bb, 3 * H), lambda b, t: (t, b, 0)),  # gx0 (time chunk)
        pl.BlockSpec((L, Bb, H), lambda b, t: (0, b, 0)),       # h0
    ] + [vmem_full] * len(flat_weights)

    kernel = _make_gru_kernel(L, Tt, H, mm_dtype)

    hidden_tm = pl.pallas_call(
        kernel,
        out_shape=jax.ShapeDtypeStruct((T, B, H), jnp.float32),
        grid=(B // Bb, T // Tt),
        in_specs=in_specs,
        out_specs=pl.BlockSpec((Tt, Bb, H), lambda b, t: (t, b, 0)),
        scratch_shapes=[pltpu.VMEM((L, Bb, H), jnp.float32)],
        compiler_params=pltpu.CompilerParams(
            # Batch tiles are independent -> "parallel" (v7x megacore);
            # time is the serial recurrence -> must stay "arbitrary".
            dimension_semantics=("parallel", "arbitrary")),
    )(gx0, h0, *flat_weights)

    hidden_states = jnp.transpose(hidden_tm, (1, 0, 2))  # (B, T, H)
    ht = hidden_states[:, -1:, :]                        # (B, 1, H)
    return hidden_states, ht


def gru_reference(x, h0, params):
    """Pure-JAX port of the PyTorch module for correctness checking."""
    B, T, E = x.shape
    L = len(params)
    h = [h0[l] for l in range(L)]
    outs = []
    ht = None
    for t in range(T):
        xt = x[:, t, :]
        for l, p in enumerate(params):
            hp = h[l]
            cat = jnp.concatenate([xt, hp], axis=-1)
            rt = jax.nn.sigmoid(cat @ p["Wu"].T + p["bu"])
            zt = jax.nn.sigmoid(cat @ p["Wr"].T + p["br"])
            cat2 = jnp.concatenate([xt, rt * hp], axis=-1)
            nt = jnp.tanh(cat2 @ p["Wn"].T + p["bn"])
            ht = (1.0 - zt) * nt + zt * hp
            xt = ht
            h[l] = ht
        outs.append(ht)
    return jnp.stack(outs, axis=1), ht[:, None, :]


def init_params(key, embedding_dimension, hidden_size, num_cells):
    """Deterministic nn.Linear-style init (uniform(-1/sqrt(in), 1/sqrt(in)))."""
    params = []
    for l in range(num_cells):
        in_features = (embedding_dimension + hidden_size) if l == 0 else 2 * hidden_size
        bound = 1.0 / jnp.sqrt(jnp.float32(in_features))
        p = {}
        for gate in ("u", "r", "n"):
            key, k1, k2 = jax.random.split(key, 3)
            p["W" + gate] = jax.random.uniform(
                k1, (hidden_size, in_features), jnp.float32, -bound, bound)
            p["b" + gate] = jax.random.uniform(
                k2, (hidden_size,), jnp.float32, -bound, bound)
        params.append(p)
    return params


if __name__ == "__main__":
    B, T, E, H, L = 4, 8, 16, 32, 2  # batch, seq, embedding, hidden, num_cells

    key = jax.random.PRNGKey(0)
    kx, kh, kp = jax.random.split(key, 3)
    x = jax.random.normal(kx, (B, T, E), jnp.float32)
    h0 = jax.random.normal(kh, (L, B, H), jnp.float32)
    params = init_params(kp, E, H, L)

    hs_ref, ht_ref = gru_reference(x, h0, params)

    # f32 path, whole sequence in one grid invocation.
    hidden_states, ht = gru_pallas(x, h0, params)
    hidden_states = jax.block_until_ready(hidden_states)
    ht = jax.block_until_ready(ht)
    assert hidden_states.shape == (B, T, H)
    assert ht.shape == (B, 1, H)
    assert jnp.allclose(hidden_states, hs_ref, atol=1e-5, rtol=1e-5)
    assert jnp.allclose(ht, ht_ref, atol=1e-5, rtol=1e-5)

    # Chunked time grid: exercises the hidden-state carry across grid steps.
    hs_chunk, ht_chunk = gru_pallas(x, h0, params, time_block=4)
    hs_chunk = jax.block_until_ready(hs_chunk)
    assert jnp.allclose(hs_chunk, hs_ref, atol=1e-5, rtol=1e-5)
    assert jnp.allclose(ht_chunk, ht_ref, atol=1e-5, rtol=1e-5)

    # bf16 matmuls with f32 accumulation (v6e/v7x recommendation).
    hs_bf16, ht_bf16 = gru_pallas(x, h0, params, use_bf16_matmul=True)
    hs_bf16 = jax.block_until_ready(hs_bf16)
    assert jnp.allclose(hs_bf16, hs_ref, atol=5e-2, rtol=5e-2)

    print("KERNEL_OK")
</pallas_src>

<mosaic_0001>
module attributes {stable_mosaic.version = 11 : i64} {
  func.func @kernel(%arg0: i32, %arg1: i32, %arg2: memref<8x4x96xf32, #tpu.memory_space<vmem>>, %arg3: memref<2x4x32xf32, #tpu.memory_space<vmem>>, %arg4: memref<32x64xf32, #tpu.memory_space<vmem>>, %arg5: memref<32x32xf32, #tpu.memory_space<vmem>>, %arg6: memref<32x96xf32, #tpu.memory_space<vmem>>, %arg7: memref<1x96xf32, #tpu.memory_space<vmem>>, %arg8: memref<32x64xf32, #tpu.memory_space<vmem>>, %arg9: memref<32x32xf32, #tpu.memory_space<vmem>>, %arg10: memref<8x4x32xf32, #tpu.memory_space<vmem>>, %arg11: memref<2x4x32xf32, #tpu.memory_space<vmem>>) attributes {dimension_semantics = [#tpu.dimension_semantics<parallel>, #tpu.dimension_semantics<arbitrary>], iteration_bounds = array<i64: 1, 1>, scalar_prefetch = 0 : i64, scratch_operands = 1 : i64, tpu.core_type = #tpu.core_type<tc>, window_params = [{transform_indices = @transform_0, window_bounds = array<i64: 8, 4, 96>}, {transform_indices = @transform_1, window_bounds = array<i64: 2, 4, 32>}, {pipeline_mode = #tpu.pipeline_mode<synchronous>, transform_indices = @transform_2, window_bounds = array<i64: 32, 64>}, {pipeline_mode = #tpu.pipeline_mode<synchronous>, transform_indices = @transform_3, window_bounds = array<i64: 32, 32>}, {pipeline_mode = #tpu.pipeline_mode<synchronous>, transform_indices = @transform_4, window_bounds = array<i64: 32, 96>}, {pipeline_mode = #tpu.pipeline_mode<synchronous>, transform_indices = @transform_5, window_bounds = array<i64: 1, 96>}, {pipeline_mode = #tpu.pipeline_mode<synchronous>, transform_indices = @transform_6, window_bounds = array<i64: 32, 64>}, {pipeline_mode = #tpu.pipeline_mode<synchronous>, transform_indices = @transform_7, window_bounds = array<i64: 32, 32>}, {transform_indices = @transform_8, window_bounds = array<i64: 8, 4, 32>}]} {
    %c0_i32 = arith.constant 0 : i32
    %0 = arith.cmpi eq, %arg1, %c0_i32 : i32
    %1 = arith.extui %0 : i1 to i32
    %c0_i32_0 = arith.constant 0 : i32
    %2 = arith.cmpi ne, %1, %c0_i32_0 : i32
    scf.if %2 {
      %c0_143 = arith.constant 0 : index
      %c0_144 = arith.constant 0 : index
      %c0_145 = arith.constant 0 : index
      %525 = vector.load %arg3[%c0_143, %c0_144, %c0_145] : memref<2x4x32xf32, #tpu.memory_space<vmem>>, vector<2x4x32xf32>
      %c0_146 = arith.constant 0 : index
      %c0_147 = arith.constant 0 : index
      %c0_148 = arith.constant 0 : index
      %526 = vector.load %arg11[%c0_146, %c0_147, %c0_148] : memref<2x4x32xf32, #tpu.memory_space<vmem>>, vector<2x4x32xf32>
      tpu.vector_store %arg11[%c0_146, %c0_147, %c0_148], %525 {strides = array<i32>} : memref<2x4x32xf32, #tpu.memory_space<vmem>>, vector<2x4x32xf32>,
    } else {
    }
    %c0 = arith.constant 0 : index
    %c0_1 = arith.constant 0 : index
    %3 = vector.load %arg4[%c0, %c0_1] : memref<32x64xf32, #tpu.memory_space<vmem>>, vector<32x64xf32>
    %c0_2 = arith.constant 0 : index
    %c0_3 = arith.constant 0 : index
    %4 = vector.load %arg5[%c0_2, %c0_3] : memref<32x32xf32, #tpu.memory_space<vmem>>, vector<32x32xf32>
    %c0_4 = arith.constant 0 : index
    %c0_5 = arith.constant 0 : index
    %5 = vector.load %arg6[%c0_4, %c0_5] : memref<32x96xf32, #tpu.memory_space<vmem>>, vector<32x96xf32>
    %c0_6 = arith.constant 0 : index
    %c0_7 = arith.constant 0 : index
    %6 = vector.load %arg7[%c0_6, %c0_7] : memref<1x96xf32, #tpu.memory_space<vmem>>, vector<1x96xf32>
    %7 = vector.shape_cast %6 : vector<1x96xf32> to vector<1x96xf32>
    %8 = vector.broadcast %7 : vector<1x96xf32> to vector<4x96xf32>
    %c0_8 = arith.constant 0 : index
    %c0_9 = arith.constant 0 : index
    %9 = vector.load %arg8[%c0_8, %c0_9] : memref<32x64xf32, #tpu.memory_space<vmem>>, vector<32x64xf32>
    %c0_10 = arith.constant 0 : index
    %c0_11 = arith.constant 0 : index
    %10 = vector.load %arg9[%c0_10, %c0_11] : memref<32x32xf32, #tpu.memory_space<vmem>>, vector<32x32xf32>
    %c0_12 = arith.constant 0 : index
    %c0_13 = arith.constant 0 : index
    %c0_14 = arith.constant 0 : index
    %11 = vector.load %arg11[%c0_12, %c0_13, %c0_14] : memref<2x4x32xf32, #tpu.memory_space<vmem>>, vector<1x4x32xf32>
    %12 = vector.shape_cast %11 : vector<1x4x32xf32> to vector<4x32xf32>
    %c1 = arith.constant 1 : index
    %c0_15 = arith.constant 0 : index
    %c0_16 = arith.constant 0 : index
    %13 = vector.load %arg11[%c1, %c0_15, %c0_16] : memref<2x4x32xf32, #tpu.memory_space<vmem>>, vector<1x4x32xf32>
    %14 = vector.shape_cast %13 : vector<1x4x32xf32> to vector<4x32xf32>
    %c0_i32_17 = arith.constant 0 : i32
    %15 = arith.index_cast %c0_i32_17 : i32 to index
    %c0_18 = arith.constant 0 : index
    %c0_19 = arith.constant 0 : index
    %16 = vector.load %arg2[%15, %c0_18, %c0_19] : memref<8x4x96xf32, #tpu.memory_space<vmem>>, vector<1x4x96xf32>
    %17 = vector.shape_cast %16 : vector<1x4x96xf32> to vector<4x96xf32>
    %cst = arith.constant dense<0.000000e+00> : vector<4x64xf32>
    %18 = tpu.matmul %12, %3, %cst {dimension_numbers = #tpu.dot_dimension_numbers<[1], [0], [0], [1], [0, 0, 1, 1], [], []>} : vector<4x32xf32>, vector<32x64xf32>, vector<4x64xf32> -> vector<4x64xf32>
    %19 = vector.extract_strided_slice %17 {offsets = [0, 0], sizes = [4, 32], strides = [1, 1]} : vector<4x96xf32> to vector<4x32xf32>
    %20 = vector.extract_strided_slice %18 {offsets = [0, 0], sizes = [4, 32], strides = [1, 1]} : vector<4x64xf32> to vector<4x32xf32>
    %21 = arith.addf %19, %20 : vector<4x32xf32>
    %22 = arith.negf %21 : vector<4x32xf32>
    %23 = math.exp %22 : vector<4x32xf32>
    %cst_20 = arith.constant 1.000000e+00 : f32
    %24 = vector.broadcast %cst_20 : f32 to vector<4x32xf32>
    %25 = arith.addf %24, %23 : vector<4x32xf32>
    %26 = arith.divf %24, %25 : vector<4x32xf32>
    %27 = vector.extract_strided_slice %17 {offsets = [0, 32], sizes = [4, 32], strides = [1, 1]} : vector<4x96xf32> to vector<4x32xf32>
    %28 = vector.extract_strided_slice %18 {offsets = [0, 32], sizes = [4, 32], strides = [1, 1]} : vector<4x64xf32> to vector<4x32xf32>
    %29 = arith.addf %27, %28 : vector<4x32xf32>
    %30 = arith.negf %29 : vector<4x32xf32>
    %31 = math.exp %30 : vector<4x32xf32>
    %cst_21 = arith.constant 1.000000e+00 : f32
    %32 = vector.broadcast %cst_21 : f32 to vector<4x32xf32>
    %33 = arith.addf %32, %31 : vector<4x32xf32>
    %34 = arith.divf %32, %33 : vector<4x32xf32>
    %35 = arith.mulf %26, %12 : vector<4x32xf32>
    %cst_22 = arith.constant dense<0.000000e+00> : vector<4x32xf32>
    %36 = tpu.matmul %35, %4, %cst_22 {dimension_numbers = #tpu.dot_dimension_numbers<[1], [0], [0], [1], [0, 0, 1, 1], [], []>} : vector<4x32xf32>, vector<32x32xf32>, vector<4x32xf32> -> vector<4x32xf32>
    %37 = vector.extract_strided_slice %17 {offsets = [0, 64], sizes = [4, 32], strides = [1, 1]} : vector<4x96xf32> to vector<4x32xf32>
    %38 = arith.addf %37, %36 : vector<4x32xf32>
    %39 = math.tanh %38 : vector<4x32xf32>
    %cst_23 = arith.constant 1.000000e+00 : f32
    %40 = vector.broadcast %cst_23 : f32 to vector<4x32xf32>
    %41 = arith.subf %40, %34 : vector<4x32xf32>
    %42 = arith.mulf %41, %39 : vector<4x32xf32>
    %43 = arith.mulf %34, %12 : vector<4x32xf32>
    %44 = arith.addf %42, %43 : vector<4x32xf32>
    %cst_24 = arith.constant dense<0.000000e+00> : vector<4x96xf32>
    %45 = tpu.matmul %44, %5, %cst_24 {dimension_numbers = #tpu.dot_dimension_numbers<[1], [0], [0], [1], [0, 0, 1, 1], [], []>} : vector<4x32xf32>, vector<32x96xf32>, vector<4x96xf32> -> vector<4x96xf32>
    %46 = arith.addf %45, %8 : vector<4x96xf32>
    %cst_25 = arith.constant dense<0.000000e+00> : vector<4x64xf32>
    %47 = tpu.matmul %14, %9, %cst_25 {dimension_numbers = #tpu.dot_dimension_numbers<[1], [0], [0], [1], [0, 0, 1, 1], [], []>} : vector<4x32xf32>, vector<32x64xf32>, vector<4x64xf32> -> vector<4x64xf32>
    %48 = vector.extract_strided_slice %46 {offsets = [0, 0], sizes = [4, 32], strides = [1, 1]} : vector<4x96xf32> to vector<4x32xf32>
    %49 = vector.extract_strided_slice %47 {offsets = [0, 0], sizes = [4, 32], strides = [1, 1]} : vector<4x64xf32> to vector<4x32xf32>
    %50 = arith.addf %48, %49 : vector<4x32xf32>
    %51 = arith.negf %50 : vector<4x32xf32>
    %52 = math.exp %51 : vector<4x32xf32>
    %cst_26 = arith.constant 1.000000e+00 : f32
    %53 = vector.broadcast %cst_26 : f32 to vector<4x32xf32>
    %54 = arith.addf %53, %52 : vector<4x32xf32>
    %55 = arith.divf %53, %54 : vector<4x32xf32>
    %56 = vector.extract_strided_slice %46 {offsets = [0, 32], sizes = [4, 32], strides = [1, 1]} : vector<4x96xf32> to vector<4x32xf32>
    %57 = vector.extract_strided_slice %47 {offsets = [0, 32], sizes = [4, 32], strides = [1, 1]} : vector<4x64xf32> to vector<4x32xf32>
    %58 = arith.addf %56, %57 : vector<4x32xf32>
    %59 = arith.negf %58 : vector<4x32xf32>
    %60 = math.exp %59 : vector<4x32xf32>
    %cst_27 = arith.constant 1.000000e+00 : f32
    %61 = vector.broadcast %cst_27 : f32 to vector<4x32xf32>
    %62 = arith.addf %61, %60 : vector<4x32xf32>
    %63 = arith.divf %61, %62 : vector<4x32xf32>
    %64 = arith.mulf %55, %14 : vector<4x32xf32>
    %cst_28 = arith.constant dense<0.000000e+00> : vector<4x32xf32>
    %65 = tpu.matmul %64, %10, %cst_28 {dimension_numbers = #tpu.dot_dimension_numbers<[1], [0], [0], [1], [0, 0, 1, 1], [], []>} : vector<4x32xf32>, vector<32x32xf32>, vector<4x32xf32> -> vector<4x32xf32>
    %66 = vector.extract_strided_slice %46 {offsets = [0, 64], sizes = [4, 32], strides = [1, 1]} : vector<4x96xf32> to vector<4x32xf32>
    %67 = arith.addf %66, %65 : vector<4x32xf32>
    %68 = math.tanh %67 : vector<4x32xf32>
    %cst_29 = arith.constant 1.000000e+00 : f32
    %69 = vector.broadcast %cst_29 : f32 to vector<4x32xf32>
    %70 = arith.subf %69, %63 : vector<4x32xf32>
    %71 = arith.mulf %70, %68 : vector<4x32xf32>
    %72 = arith.mulf %63, %14 : vector<4x32xf32>
    %73 = arith.addf %71, %72 : vector<4x32xf32>
    %74 = arith.index_cast %c0_i32_17 : i32 to index
    %c0_30 = arith.constant 0 : index
    %c0_31 = arith.constant 0 : index
    %75 = vector.load %arg10[%74, %c0_30, %c0_31] : memref<8x4x32xf32, #tpu.memory_space<vmem>>, vector<1x4x32xf32>
    %76 = vector.shape_cast %75 : vector<1x4x32xf32> to vector<4x32xf32>
    %77 = vector.shape_cast %73 : vector<4x32xf32> to vector<1x4x32xf32>
    tpu.vector_store %arg10[%74, %c0_30, %c0_31], %77 {strides = array<i32>} : memref<8x4x32xf32, #tpu.memory_space<vmem>>, vector<1x4x32xf32>,
    %c1_i32 = arith.constant 1 : i32
    %78 = arith.index_cast %c1_i32 : i32 to index
    %c0_32 = arith.constant 0 : index
    %c0_33 = arith.constant 0 : index
    %79 = vector.load %arg2[%78, %c0_32, %c0_33] : memref<8x4x96xf32, #tpu.memory_space<vmem>>, vector<1x4x96xf32>
    %80 = vector.shape_cast %79 : vector<1x4x96xf32> to vector<4x96xf32>
    %cst_34 = arith.constant dense<0.000000e+00> : vector<4x64xf32>
    %81 = tpu.matmul %44, %3, %cst_34 {dimension_numbers = #tpu.dot_dimension_numbers<[1], [0], [0], [1], [0, 0, 1, 1], [], []>} : vector<4x32xf32>, vector<32x64xf32>, vector<4x64xf32> -> vector<4x64xf32>
    %82 = vector.extract_strided_slice %80 {offsets = [0, 0], sizes = [4, 32], strides = [1, 1]} : vector<4x96xf32> to vector<4x32xf32>
    %83 = vector.extract_strided_slice %81 {offsets = [0, 0], sizes = [4, 32], strides = [1, 1]} : vector<4x64xf32> to vector<4x32xf32>
    %84 = arith.addf %82, %83 : vector<4x32xf32>
    %85 = arith.negf %84 : vector<4x32xf32>
    %86 = math.exp %85 : vector<4x32xf32>
    %cst_35 = arith.constant 1.000000e+00 : f32
    %87 = vector.broadcast %cst_35 : f32 to vector<4x32xf32>
    %88 = arith.addf %87, %86 : vector<4x32xf32>
    %89 = arith.divf %87, %88 : vector<4x32xf32>
    %90 = vector.extract_strided_slice %80 {offsets = [0, 32], sizes = [4, 32], strides = [1, 1]} : vector<4x96xf32> to vector<4x32xf32>
    %91 = vector.extract_strided_slice %81 {offsets = [0, 32], sizes = [4, 32], strides = [1, 1]} : vector<4x64xf32> to vector<4x32xf32>
    %92 = arith.addf %90, %91 : vector<4x32xf32>
    %93 = arith.negf %92 : vector<4x32xf32>
    %94 = math.exp %93 : vector<4x32xf32>
    %cst_36 = arith.constant 1.000000e+00 : f32
    %95 = vector.broadcast %cst_36 : f32 to vector<4x32xf32>
    %96 = arith.addf %95, %94 : vector<4x32xf32>
    %97 = arith.divf %95, %96 : vector<4x32xf32>
    %98 = arith.mulf %89, %44 : vector<4x32xf32>
    %cst_37 = arith.constant dense<0.000000e+00> : vector<4x32xf32>
    %99 = tpu.matmul %98, %4, %cst_37 {dimension_numbers = #tpu.dot_dimension_numbers<[1], [0], [0], [1], [0, 0, 1, 1], [], []>} : vector<4x32xf32>, vector<32x32xf32>, vector<4x32xf32> -> vector<4x32xf32>
    %100 = vector.extract_strided_slice %80 {offsets = [0, 64], sizes = [4, 32], strides = [1, 1]} : vector<4x96xf32> to vector<4x32xf32>
    %101 = arith.addf %100, %99 : vector<4x32xf32>
    %102 = math.tanh %101 : vector<4x32xf32>
    %cst_38 = arith.constant 1.000000e+00 : f32
    %103 = vector.broadcast %cst_38 : f32 to vector<4x32xf32>
    %104 = arith.subf %103, %97 : vector<4x32xf32>
    %105 = arith.mulf %104, %102 : vector<4x32xf32>
    %106 = arith.mulf %97, %44 : vector<4x32xf32>
    %107 = arith.addf %105, %106 : vector<4x32xf32>
    %cst_39 = arith.constant dense<0.000000e+00> : vector<4x96xf32>
    %108 = tpu.matmul %107, %5, %cst_39 {dimension_numbers = #tpu.dot_dimension_numbers<[1], [0], [0], [1], [0, 0, 1, 1], [], []>} : vector<4x32xf32>, vector<32x96xf32>, vector<4x96xf32> -> vector<4x96xf32>
    %109 = arith.addf %108, %8 : vector<4x96xf32>
    %cst_40 = arith.constant dense<0.000000e+00> : vector<4x64xf32>
    %110 = tpu.matmul %73, %9, %cst_40 {dimension_numbers = #tpu.dot_dimension_numbers<[1], [0], [0], [1], [0, 0, 1, 1], [], []>} : vector<4x32xf32>, vector<32x64xf32>, vector<4x64xf32> -> vector<4x64xf32>
    %111 = vector.extract_strided_slice %109 {offsets = [0, 0], sizes = [4, 32], strides = [1, 1]} : vector<4x96xf32> to vector<4x32xf32>
    %112 = vector.extract_strided_slice %110 {offsets = [0, 0], sizes = [4, 32], strides = [1, 1]} : vector<4x64xf32> to vector<4x32xf32>
    %113 = arith.addf %111, %112 : vector<4x32xf32>
    %114 = arith.negf %113 : vector<4x32xf32>
    %115 = math.exp %114 : vector<4x32xf32>
    %cst_41 = arith.constant 1.000000e+00 : f32
    %116 = vector.broadcast %cst_41 : f32 to vector<4x32xf32>
    %117 = arith.addf %116, %115 : vector<4x32xf32>
    %118 = arith.divf %116, %117 : vector<4x32xf32>
    %119 = vector.extract_strided_slice %109 {offsets = [0, 32], sizes = [4, 32], strides = [1, 1]} : vector<4x96xf32> to vector<4x32xf32>
    %120 = vector.extract_strided_slice %110 {offsets = [0, 32], sizes = [4, 32], strides = [1, 1]} : vector<4x64xf32> to vector<4x32xf32>
    %121 = arith.addf %119, %120 : vector<4x32xf32>
    %122 = arith.negf %121 : vector<4x32xf32>
    %123 = math.exp %122 : vector<4x32xf32>
    %cst_42 = arith.constant 1.000000e+00 : f32
    %124 = vector.broadcast %cst_42 : f32 to vector<4x32xf32>
    %125 = arith.addf %124, %123 : vector<4x32xf32>
    %126 = arith.divf %124, %125 : vector<4x32xf32>
    %127 = arith.mulf %118, %73 : vector<4x32xf32>
    %cst_43 = arith.constant dense<0.000000e+00> : vector<4x32xf32>
    %128 = tpu.matmul %127, %10, %cst_43 {dimension_numbers = #tpu.dot_dimension_numbers<[1], [0], [0], [1], [0, 0, 1, 1], [], []>} : vector<4x32xf32>, vector<32x32xf32>, vector<4x32xf32> -> vector<4x32xf32>
    %129 = vector.extract_strided_slice %109 {offsets = [0, 64], sizes = [4, 32], strides = [1, 1]} : vector<4x96xf32> to vector<4x32xf32>
    %130 = arith.addf %129, %128 : vector<4x32xf32>
    %131 = math.tanh %130 : vector<4x32xf32>
    %cst_44 = arith.constant 1.000000e+00 : f32
    %132 = vector.broadcast %cst_44 : f32 to vector<4x32xf32>
    %133 = arith.subf %132, %126 : vector<4x32xf32>
    %134 = arith.mulf %133, %131 : vector<4x32xf32>
    %135 = arith.mulf %126, %73 : vector<4x32xf32>
    %136 = arith.addf %134, %135 : vector<4x32xf32>
    %137 = arith.index_cast %c1_i32 : i32 to index
    %c0_45 = arith.constant 0 : index
    %c0_46 = arith.constant 0 : index
    %138 = vector.load %arg10[%137, %c0_45, %c0_46] : memref<8x4x32xf32, #tpu.memory_space<vmem>>, vector<1x4x32xf32>
    %139 = vector.shape_cast %138 : vector<1x4x32xf32> to vector<4x32xf32>
    %140 = vector.shape_cast %136 : vector<4x32xf32> to vector<1x4x32xf32>
    tpu.vector_store %arg10[%137, %c0_45, %c0_46], %140 {strides = array<i32>} : memref<8x4x32xf32, #tpu.memory_space<vmem>>, vector<1x4x32xf32>,
    %c2_i32 = arith.constant 2 : i32
    %141 = arith.index_cast %c2_i32 : i32 to index
    %c0_47 = arith.constant 0 : index
    %c0_48 = arith.constant 0 : index
    %142 = vector.load %arg2[%141, %c0_47, %c0_48] : memref<8x4x96xf32, #tpu.memory_space<vmem>>, vector<1x4x96xf32>
    %143 = vector.shape_cast %142 : vector<1x4x96xf32> to vector<4x96xf32>
    %cst_49 = arith.constant dense<0.000000e+00> : vector<4x64xf32>
    %144 = tpu.matmul %107, %3, %cst_49 {dimension_numbers = #tpu.dot_dimension_numbers<[1], [0], [0], [1], [0, 0, 1, 1], [], []>} : vector<4x32xf32>, vector<32x64xf32>, vector<4x64xf32> -> vector<4x64xf32>
    %145 = vector.extract_strided_slice %143 {offsets = [0, 0], sizes = [4, 32], strides = [1, 1]} : vector<4x96xf32> to vector<4x32xf32>
    %146 = vector.extract_strided_slice %144 {offsets = [0, 0], sizes = [4, 32], strides = [1, 1]} : vector<4x64xf32> to vector<4x32xf32>
    %147 = arith.addf %145, %146 : vector<4x32xf32>
    %148 = arith.negf %147 : vector<4x32xf32>
    %149 = math.exp %148 : vector<4x32xf32>
    %cst_50 = arith.constant 1.000000e+00 : f32
    %150 = vector.broadcast %cst_50 : f32 to vector<4x32xf32>
    %151 = arith.addf %150, %149 : vector<4x32xf32>
    %152 = arith.divf %150, %151 : vector<4x32xf32>
    %153 = vector.extract_strided_slice %143 {offsets = [0, 32], sizes = [4, 32], strides = [1, 1]} : vector<4x96xf32> to vector<4x32xf32>
    %154 = vector.extract_strided_slice %144 {offsets = [0, 32], sizes = [4, 32], strides = [1, 1]} : vector<4x64xf32> to vector<4x32xf32>
    %155 = arith.addf %153, %154 : vector<4x32xf32>
    %156 = arith.negf %155 : vector<4x32xf32>
    %157 = math.exp %156 : vector<4x32xf32>
    %cst_51 = arith.constant 1.000000e+00 : f32
    %158 = vector.broadcast %cst_51 : f32 to vector<4x32xf32>
    %159 = arith.addf %158, %157 : vector<4x32xf32>
    %160 = arith.divf %158, %159 : vector<4x32xf32>
    %161 = arith.mulf %152, %107 : vector<4x32xf32>
    %cst_52 = arith.constant dense<0.000000e+00> : vector<4x32xf32>
    %162 = tpu.matmul %161, %4, %cst_52 {dimension_numbers = #tpu.dot_dimension_numbers<[1], [0], [0], [1], [0, 0, 1, 1], [], []>} : vector<4x32xf32>, vector<32x32xf32>, vector<4x32xf32> -> vector<4x32xf32>
    %163 = vector.extract_strided_slice %143 {offsets = [0, 64], sizes = [4, 32], strides = [1, 1]} : vector<4x96xf32> to vector<4x32xf32>
    %164 = arith.addf %163, %162 : vector<4x32xf32>
    %165 = math.tanh %164 : vector<4x32xf32>
    %cst_53 = arith.constant 1.000000e+00 : f32
    %166 = vector.broadcast %cst_53 : f32 to vector<4x32xf32>
    %167 = arith.subf %166, %160 : vector<4x32xf32>
    %168 = arith.mulf %167, %165 : vector<4x32xf32>
    %169 = arith.mulf %160, %107 : vector<4x32xf32>
    %170 = arith.addf %168, %169 : vector<4x32xf32>
    %cst_54 = arith.constant dense<0.000000e+00> : vector<4x96xf32>
    %171 = tpu.matmul %170, %5, %cst_54 {dimension_numbers = #tpu.dot_dimension_numbers<[1], [0], [0], [1], [0, 0, 1, 1], [], []>} : vector<4x32xf32>, vector<32x96xf32>, vector<4x96xf32> -> vector<4x96xf32>
    %172 = arith.addf %171, %8 : vector<4x96xf32>
    %cst_55 = arith.constant dense<0.000000e+00> : vector<4x64xf32>
    %173 = tpu.matmul %136, %9, %cst_55 {dimension_numbers = #tpu.dot_dimension_numbers<[1], [0], [0], [1], [0, 0, 1, 1], [], []>} : vector<4x32xf32>, vector<32x64xf32>, vector<4x64xf32> -> vector<4x64xf32>
    %174 = vector.extract_strided_slice %172 {offsets = [0, 0], sizes = [4, 32], strides = [1, 1]} : vector<4x96xf32> to vector<4x32xf32>
    %175 = vector.extract_strided_slice %173 {offsets = [0, 0], sizes = [4, 32], strides = [1, 1]} : vector<4x64xf32> to vector<4x32xf32>
    %176 = arith.addf %174, %175 : vector<4x32xf32>
    %177 = arith.negf %176 : vector<4x32xf32>
    %178 = math.exp %177 : vector<4x32xf32>
    %cst_56 = arith.constant 1.000000e+00 : f32
    %179 = vector.broadcast %cst_56 : f32 to vector<4x32xf32>
    %180 = arith.addf %179, %178 : vector<4x32xf32>
    %181 = arith.divf %179, %180 : vector<4x32xf32>
    %182 = vector.extract_strided_slice %172 {offsets = [0, 32], sizes = [4, 32], strides = [1, 1]} : vector<4x96xf32> to vector<4x32xf32>
    %183 = vector.extract_strided_slice %173 {offsets = [0, 32], sizes = [4, 32], strides = [1, 1]} : vector<4x64xf32> to vector<4x32xf32>
    %184 = arith.addf %182, %183 : vector<4x32xf32>
    %185 = arith.negf %184 : vector<4x32xf32>
    %186 = math.exp %185 : vector<4x32xf32>
    %cst_57 = arith.constant 1.000000e+00 : f32
    %187 = vector.broadcast %cst_57 : f32 to vector<4x32xf32>
    %188 = arith.addf %187, %186 : vector<4x32xf32>
    %189 = arith.divf %187, %188 : vector<4x32xf32>
    %190 = arith.mulf %181, %136 : vector<4x32xf32>
    %cst_58 = arith.constant dense<0.000000e+00> : vector<4x32xf32>
    %191 = tpu.matmul %190, %10, %cst_58 {dimension_numbers = #tpu.dot_dimension_numbers<[1], [0], [0], [1], [0, 0, 1, 1], [], []>} : vector<4x32xf32>, vector<32x32xf32>, vector<4x32xf32> -> vector<4x32xf32>
    %192 = vector.extract_strided_slice %172 {offsets = [0, 64], sizes = [4, 32], strides = [1, 1]} : vector<4x96xf32> to vector<4x32xf32>
    %193 = arith.addf %192, %191 : vector<4x32xf32>
    %194 = math.tanh %193 : vector<4x32xf32>
    %cst_59 = arith.constant 1.000000e+00 : f32
    %195 = vector.broadcast %cst_59 : f32 to vector<4x32xf32>
    %196 = arith.subf %195, %189 : vector<4x32xf32>
    %197 = arith.mulf %196, %194 : vector<4x32xf32>
    %198 = arith.mulf %189, %136 : vector<4x32xf32>
    %199 = arith.addf %197, %198 : vector<4x32xf32>
    %200 = arith.index_cast %c2_i32 : i32 to index
    %c0_60 = arith.constant 0 : index
    %c0_61 = arith.constant 0 : index
    %201 = vector.load %arg10[%200, %c0_60, %c0_61] : memref<8x4x32xf32, #tpu.memory_space<vmem>>, vector<1x4x32xf32>
    %202 = vector.shape_cast %201 : vector<1x4x32xf32> to vector<4x32xf32>
    %203 = vector.shape_cast %199 : vector<4x32xf32> to vector<1x4x32xf32>
    tpu.vector_store %arg10[%200, %c0_60, %c0_61], %203 {strides = array<i32>} : memref<8x4x32xf32, #tpu.memory_space<vmem>>, vector<1x4x32xf32>,
    %c3_i32 = arith.constant 3 : i32
    %204 = arith.index_cast %c3_i32 : i32 to index
    %c0_62 = arith.constant 0 : index
    %c0_63 = arith.constant 0 : index
    %205 = vector.load %arg2[%204, %c0_62, %c0_63] : memref<8x4x96xf32, #tpu.memory_space<vmem>>, vector<1x4x96xf32>
    %206 = vector.shape_cast %205 : vector<1x4x96xf32> to vector<4x96xf32>
    %cst_64 = arith.constant dense<0.000000e+00> : vector<4x64xf32>
    %207 = tpu.matmul %170, %3, %cst_64 {dimension_numbers = #tpu.dot_dimension_numbers<[1], [0], [0], [1], [0, 0, 1, 1], [], []>} : vector<4x32xf32>, vector<32x64xf32>, vector<4x64xf32> -> vector<4x64xf32>
    %208 = vector.extract_strided_slice %206 {offsets = [0, 0], sizes = [4, 32], strides = [1, 1]} : vector<4x96xf32> to vector<4x32xf32>
    %209 = vector.extract_strided_slice %207 {offsets = [0, 0], sizes = [4, 32], strides = [1, 1]} : vector<4x64xf32> to vector<4x32xf32>
    %210 = arith.addf %208, %209 : vector<4x32xf32>
    %211 = arith.negf %210 : vector<4x32xf32>
    %212 = math.exp %211 : vector<4x32xf32>
    %cst_65 = arith.constant 1.000000e+00 : f32
    %213 = vector.broadcast %cst_65 : f32 to vector<4x32xf32>
    %214 = arith.addf %213, %212 : vector<4x32xf32>
    %215 = arith.divf %213, %214 : vector<4x32xf32>
    %216 = vector.extract_strided_slice %206 {offsets = [0, 32], sizes = [4, 32], strides = [1, 1]} : vector<4x96xf32> to vector<4x32xf32>
    %217 = vector.extract_strided_slice %207 {offsets = [0, 32], sizes = [4, 32], strides = [1, 1]} : vector<4x64xf32> to vector<4x32xf32>
    %218 = arith.addf %216, %217 : vector<4x32xf32>
    %219 = arith.negf %218 : vector<4x32xf32>
    %220 = math.exp %219 : vector<4x32xf32>
    %cst_66 = arith.constant 1.000000e+00 : f32
    %221 = vector.broadcast %cst_66 : f32 to vector<4x32xf32>
    %222 = arith.addf %221, %220 : vector<4x32xf32>
    %223 = arith.divf %221, %222 : vector<4x32xf32>
    %224 = arith.mulf %215, %170 : vector<4x32xf32>
    %cst_67 = arith.constant dense<0.000000e+00> : vector<4x32xf32>
    %225 = tpu.matmul %224, %4, %cst_67 {dimension_numbers = #tpu.dot_dimension_numbers<[1], [0], [0], [1], [0, 0, 1, 1], [], []>} : vector<4x32xf32>, vector<32x32xf32>, vector<4x32xf32> -> vector<4x32xf32>
    %226 = vector.extract_strided_slice %206 {offsets = [0, 64], sizes = [4, 32], strides = [1, 1]} : vector<4x96xf32> to vector<4x32xf32>
    %227 = arith.addf %226, %225 : vector<4x32xf32>
    %228 = math.tanh %227 : vector<4x32xf32>
    %cst_68 = arith.constant 1.000000e+00 : f32
    %229 = vector.broadcast %cst_68 : f32 to vector<4x32xf32>
    %230 = arith.subf %229, %223 : vector<4x32xf32>
    %231 = arith.mulf %230, %228 : vector<4x32xf32>
    %232 = arith.mulf %223, %170 : vector<4x32xf32>
    %233 = arith.addf %231, %232 : vector<4x32xf32>
    %cst_69 = arith.constant dense<0.000000e+00> : vector<4x96xf32>
    %234 = tpu.matmul %233, %5, %cst_69 {dimension_numbers = #tpu.dot_dimension_numbers<[1], [0], [0], [1], [0, 0, 1, 1], [], []>} : vector<4x32xf32>, vector<32x96xf32>, vector<4x96xf32> -> vector<4x96xf32>
    %235 = arith.addf %234, %8 : vector<4x96xf32>
    %cst_70 = arith.constant dense<0.000000e+00> : vector<4x64xf32>
    %236 = tpu.matmul %199, %9, %cst_70 {dimension_numbers = #tpu.dot_dimension_numbers<[1], [0], [0], [1], [0, 0, 1, 1], [], []>} : vector<4x32xf32>, vector<32x64xf32>, vector<4x64xf32> -> vector<4x64xf32>
    %237 = vector.extract_strided_slice %235 {offsets = [0, 0], sizes = [4, 32], strides = [1, 1]} : vector<4x96xf32> to vector<4x32xf32>
    %238 = vector.extract_strided_slice %236 {offsets = [0, 0], sizes = [4, 32], strides = [1, 1]} : vector<4x64xf32> to vector<4x32xf32>
    %239 = arith.addf %237, %238 : vector<4x32xf32>
    %240 = arith.negf %239 : vector<4x32xf32>
    %241 = math.exp %240 : vector<4x32xf32>
    %cst_71 = arith.constant 1.000000e+00 : f32
    %242 = vector.broadcast %cst_71 : f32 to vector<4x32xf32>
    %243 = arith.addf %242, %241 : vector<4x32xf32>
    %244 = arith.divf %242, %243 : vector<4x32xf32>
    %245 = vector.extract_strided_slice %235 {offsets = [0, 32], sizes = [4, 32], strides = [1, 1]} : vector<4x96xf32> to vector<4x32xf32>
    %246 = vector.extract_strided_slice %236 {offsets = [0, 32], sizes = [4, 32], strides = [1, 1]} : vector<4x64xf32> to vector<4x32xf32>
    %247 = arith.addf %245, %246 : vector<4x32xf32>
    %248 = arith.negf %247 : vector<4x32xf32>
    %249 = math.exp %248 : vector<4x32xf32>
    %cst_72 = arith.constant 1.000000e+00 : f32
    %250 = vector.broadcast %cst_72 : f32 to vector<4x32xf32>
    %251 = arith.addf %250, %249 : vector<4x32xf32>
    %252 = arith.divf %250, %251 : vector<4x32xf32>
    %253 = arith.mulf %244, %199 : vector<4x32xf32>
    %cst_73 = arith.constant dense<0.000000e+00> : vector<4x32xf32>
    %254 = tpu.matmul %253, %10, %cst_73 {dimension_numbers = #tpu.dot_dimension_numbers<[1], [0], [0], [1], [0, 0, 1, 1], [], []>} : vector<4x32xf32>, vector<32x32xf32>, vector<4x32xf32> -> vector<4x32xf32>
    %255 = vector.extract_strided_slice %235 {offsets = [0, 64], sizes = [4, 32], strides = [1, 1]} : vector<4x96xf32> to vector<4x32xf32>
    %256 = arith.addf %255, %254 : vector<4x32xf32>
    %257 = math.tanh %256 : vector<4x32xf32>
    %cst_74 = arith.constant 1.000000e+00 : f32
    %258 = vector.broadcast %cst_74 : f32 to vector<4x32xf32>
    %259 = arith.subf %258, %252 : vector<4x32xf32>
    %260 = arith.mulf %259, %257 : vector<4x32xf32>
    %261 = arith.mulf %252, %199 : vector<4x32xf32>
    %262 = arith.addf %260, %261 : vector<4x32xf32>
    %263 = arith.index_cast %c3_i32 : i32 to index
    %c0_75 = arith.constant 0 : index
    %c0_76 = arith.constant 0 : index
    %264 = vector.load %arg10[%263, %c0_75, %c0_76] : memref<8x4x32xf32, #tpu.memory_space<vmem>>, vector<1x4x32xf32>
    %265 = vector.shape_cast %264 : vector<1x4x32xf32> to vector<4x32xf32>
    %266 = vector.shape_cast %262 : vector<4x32xf32> to vector<1x4x32xf32>
    tpu.vector_store %arg10[%263, %c0_75, %c0_76], %266 {strides = array<i32>} : memref<8x4x32xf32, #tpu.memory_space<vmem>>, vector<1x4x32xf32>,
    %c4_i32 = arith.constant 4 : i32
    %267 = arith.index_cast %c4_i32 : i32 to index
    %c0_77 = arith.constant 0 : index
    %c0_78 = arith.constant 0 : index
    %268 = vector.load %arg2[%267, %c0_77, %c0_78] : memref<8x4x96xf32, #tpu.memory_space<vmem>>, vector<1x4x96xf32>
    %269 = vector.shape_cast %268 : vector<1x4x96xf32> to vector<4x96xf32>
    %cst_79 = arith.constant dense<0.000000e+00> : vector<4x64xf32>
    %270 = tpu.matmul %233, %3, %cst_79 {dimension_numbers = #tpu.dot_dimension_numbers<[1], [0], [0], [1], [0, 0, 1, 1], [], []>} : vector<4x32xf32>, vector<32x64xf32>, vector<4x64xf32> -> vector<4x64xf32>
    %271 = vector.extract_strided_slice %269 {offsets = [0, 0], sizes = [4, 32], strides = [1, 1]} : vector<4x96xf32> to vector<4x32xf32>
    %272 = vector.extract_strided_slice %270 {offsets = [0, 0], sizes = [4, 32], strides = [1, 1]} : vector<4x64xf32> to vector<4x32xf32>
    %273 = arith.addf %271, %272 : vector<4x32xf32>
    %274 = arith.negf %273 : vector<4x32xf32>
    %275 = math.exp %274 : vector<4x32xf32>
    %cst_80 = arith.constant 1.000000e+00 : f32
    %276 = vector.broadcast %cst_80 : f32 to vector<4x32xf32>
    %277 = arith.addf %276, %275 : vector<4x32xf32>
    %278 = arith.divf %276, %277 : vector<4x32xf32>
    %279 = vector.extract_strided_slice %269 {offsets = [0, 32], sizes = [4, 32], strides = [1, 1]} : vector<4x96xf32> to vector<4x32xf32>
    %280 = vector.extract_strided_slice %270 {offsets = [0, 32], sizes = [4, 32], strides = [1, 1]} : vector<4x64xf32> to vector<4x32xf32>
    %281 = arith.addf %279, %280 : vector<4x32xf32>
    %282 = arith.negf %281 : vector<4x32xf32>
    %283 = math.exp %282 : vector<4x32xf32>
    %cst_81 = arith.constant 1.000000e+00 : f32
    %284 = vector.broadcast %cst_81 : f32 to vector<4x32xf32>
    %285 = arith.addf %284, %283 : vector<4x32xf32>
    %286 = arith.divf %284, %285 : vector<4x32xf32>
    %287 = arith.mulf %278, %233 : vector<4x32xf32>
    %cst_82 = arith.constant dense<0.000000e+00> : vector<4x32xf32>
    %288 = tpu.matmul %287, %4, %cst_82 {dimension_numbers = #tpu.dot_dimension_numbers<[1], [0], [0], [1], [0, 0, 1, 1], [], []>} : vector<4x32xf32>, vector<32x32xf32>, vector<4x32xf32> -> vector<4x32xf32>
    %289 = vector.extract_strided_slice %269 {offsets = [0, 64], sizes = [4, 32], strides = [1, 1]} : vector<4x96xf32> to vector<4x32xf32>
    %290 = arith.addf %289, %288 : vector<4x32xf32>
    %291 = math.tanh %290 : vector<4x32xf32>
    %cst_83 = arith.constant 1.000000e+00 : f32
    %292 = vector.broadcast %cst_83 : f32 to vector<4x32xf32>
    %293 = arith.subf %292, %286 : vector<4x32xf32>
    %294 = arith.mulf %293, %291 : vector<4x32xf32>
    %295 = arith.mulf %286, %233 : vector<4x32xf32>
    %296 = arith.addf %294, %295 : vector<4x32xf32>
    %cst_84 = arith.constant dense<0.000000e+00> : vector<4x96xf32>
    %297 = tpu.matmul %296, %5, %cst_84 {dimension_numbers = #tpu.dot_dimension_numbers<[1], [0], [0], [1], [0, 0, 1, 1], [], []>} : vector<4x32xf32>, vector<32x96xf32>, vector<4x96xf32> -> vector<4x96xf32>
    %298 = arith.addf %297, %8 : vector<4x96xf32>
    %cst_85 = arith.constant dense<0.000000e+00> : vector<4x64xf32>
    %299 = tpu.matmul %262, %9, %cst_85 {dimension_numbers = #tpu.dot_dimension_numbers<[1], [0], [0], [1], [0, 0, 1, 1], [], []>} : vector<4x32xf32>, vector<32x64xf32>, vector<4x64xf32> -> vector<4x64xf32>
    %300 = vector.extract_strided_slice %298 {offsets = [0, 0], sizes = [4, 32], strides = [1, 1]} : vector<4x96xf32> to vector<4x32xf32>
    %301 = vector.extract_strided_slice %299 {offsets = [0, 0], sizes = [4, 32], strides = [1, 1]} : vector<4x64xf32> to vector<4x32xf32>
    %302 = arith.addf %300, %301 : vector<4x32xf32>
    %303 = arith.negf %302 : vector<4x32xf32>
    %304 = math.exp %303 : vector<4x32xf32>
    %cst_86 = arith.constant 1.000000e+00 : f32
    %305 = vector.broadcast %cst_86 : f32 to vector<4x32xf32>
    %306 = arith.addf %305, %304 : vector<4x32xf32>
    %307 = arith.divf %305, %306 : vector<4x32xf32>
    %308 = vector.extract_strided_slice %298 {offsets = [0, 32], sizes = [4, 32], strides = [1, 1]} : vector<4x96xf32> to vector<4x32xf32>
    %309 = vector.extract_strided_slice %299 {offsets = [0, 32], sizes = [4, 32], strides = [1, 1]} : vector<4x64xf32> to vector<4x32xf32>
    %310 = arith.addf %308, %309 : vector<4x32xf32>
    %311 = arith.negf %310 : vector<4x32xf32>
    %312 = math.exp %311 : vector<4x32xf32>
    %cst_87 = arith.constant 1.000000e+00 : f32
    %313 = vector.broadcast %cst_87 : f32 to vector<4x32xf32>
    %314 = arith.addf %313, %312 : vector<4x32xf32>
    %315 = arith.divf %313, %314 : vector<4x32xf32>
    %316 = arith.mulf %307, %262 : vector<4x32xf32>
    %cst_88 = arith.constant dense<0.000000e+00> : vector<4x32xf32>
    %317 = tpu.matmul %316, %10, %cst_88 {dimension_numbers = #tpu.dot_dimension_numbers<[1], [0], [0], [1], [0, 0, 1, 1], [], []>} : vector<4x32xf32>, vector<32x32xf32>, vector<4x32xf32> -> vector<4x32xf32>
    %318 = vector.extract_strided_slice %298 {offsets = [0, 64], sizes = [4, 32], strides = [1, 1]} : vector<4x96xf32> to vector<4x32xf32>
    %319 = arith.addf %318, %317 : vector<4x32xf32>
    %320 = math.tanh %319 : vector<4x32xf32>
    %cst_89 = arith.constant 1.000000e+00 : f32
    %321 = vector.broadcast %cst_89 : f32 to vector<4x32xf32>
    %322 = arith.subf %321, %315 : vector<4x32xf32>
    %323 = arith.mulf %322, %320 : vector<4x32xf32>
    %324 = arith.mulf %315, %262 : vector<4x32xf32>
    %325 = arith.addf %323, %324 : vector<4x32xf32>
    %326 = arith.index_cast %c4_i32 : i32 to index
    %c0_90 = arith.constant 0 : index
    %c0_91 = arith.constant 0 : index
    %327 = vector.load %arg10[%326, %c0_90, %c0_91] : memref<8x4x32xf32, #tpu.memory_space<vmem>>, vector<1x4x32xf32>
    %328 = vector.shape_cast %327 : vector<1x4x32xf32> to vector<4x32xf32>
    %329 = vector.shape_cast %325 : vector<4x32xf32> to vector<1x4x32xf32>
    tpu.vector_store %arg10[%326, %c0_90, %c0_91], %329 {strides = array<i32>} : memref<8x4x32xf32, #tpu.memory_space<vmem>>, vector<1x4x32xf32>,
    %c5_i32 = arith.constant 5 : i32
    %330 = arith.index_cast %c5_i32 : i32 to index
    %c0_92 = arith.constant 0 : index
    %c0_93 = arith.constant 0 : index
    %331 = vector.load %arg2[%330, %c0_92, %c0_93] : memref<8x4x96xf32, #tpu.memory_space<vmem>>, vector<1x4x96xf32>
    %332 = vector.shape_cast %331 : vector<1x4x96xf32> to vector<4x96xf32>
    %cst_94 = arith.constant dense<0.000000e+00> : vector<4x64xf32>
    %333 = tpu.matmul %296, %3, %cst_94 {dimension_numbers = #tpu.dot_dimension_numbers<[1], [0], [0], [1], [0, 0, 1, 1], [], []>} : vector<4x32xf32>, vector<32x64xf32>, vector<4x64xf32> -> vector<4x64xf32>
    %334 = vector.extract_strided_slice %332 {offsets = [0, 0], sizes = [4, 32], strides = [1, 1]} : vector<4x96xf32> to vector<4x32xf32>
    %335 = vector.extract_strided_slice %333 {offsets = [0, 0], sizes = [4, 32], strides = [1, 1]} : vector<4x64xf32> to vector<4x32xf32>
    %336 = arith.addf %334, %335 : vector<4x32xf32>
    %337 = arith.negf %336 : vector<4x32xf32>
    %338 = math.exp %337 : vector<4x32xf32>
    %cst_95 = arith.constant 1.000000e+00 : f32
    %339 = vector.broadcast %cst_95 : f32 to vector<4x32xf32>
    %340 = arith.addf %339, %338 : vector<4x32xf32>
    %341 = arith.divf %339, %340 : vector<4x32xf32>
    %342 = vector.extract_strided_slice %332 {offsets = [0, 32], sizes = [4, 32], strides = [1, 1]} : vector<4x96xf32> to vector<4x32xf32>
    %343 = vector.extract_strided_slice %333 {offsets = [0, 32], sizes = [4, 32], strides = [1, 1]} : vector<4x64xf32> to vector<4x32xf32>
    %344 = arith.addf %342, %343 : vector<4x32xf32>
    %345 = arith.negf %344 : vector<4x32xf32>
    %346 = math.exp %345 : vector<4x32xf32>
    %cst_96 = arith.constant 1.000000e+00 : f32
    %347 = vector.broadcast %cst_96 : f32 to vector<4x32xf32>
    %348 = arith.addf %347, %346 : vector<4x32xf32>
    %349 = arith.divf %347, %348 : vector<4x32xf32>
    %350 = arith.mulf %341, %296 : vector<4x32xf32>
    %cst_97 = arith.constant dense<0.000000e+00> : vector<4x32xf32>
    %351 = tpu.matmul %350, %4, %cst_97 {dimension_numbers = #tpu.dot_dimension_numbers<[1], [0], [0], [1], [0, 0, 1, 1], [], []>} : vector<4x32xf32>, vector<32x32xf32>, vector<4x32xf32> -> vector<4x32xf32>
    %352 = vector.extract_strided_slice %332 {offsets = [0, 64], sizes = [4, 32], strides = [1, 1]} : vector<4x96xf32> to vector<4x32xf32>
    %353 = arith.addf %352, %351 : vector<4x32xf32>
    %354 = math.tanh %353 : vector<4x32xf32>
    %cst_98 = arith.constant 1.000000e+00 : f32
    %355 = vector.broadcast %cst_98 : f32 to vector<4x32xf32>
    %356 = arith.subf %355, %349 : vector<4x32xf32>
    %357 = arith.mulf %356, %354 : vector<4x32xf32>
    %358 = arith.mulf %349, %296 : vector<4x32xf32>
    %359 = arith.addf %357, %358 : vector<4x32xf32>
    %cst_99 = arith.constant dense<0.000000e+00> : vector<4x96xf32>
    %360 = tpu.matmul %359, %5, %cst_99 {dimension_numbers = #tpu.dot_dimension_numbers<[1], [0], [0], [1], [0, 0, 1, 1], [], []>} : vector<4x32xf32>, vector<32x96xf32>, vector<4x96xf32> -> vector<4x96xf32>
    %361 = arith.addf %360, %8 : vector<4x96xf32>
    %cst_100 = arith.constant dense<0.000000e+00> : vector<4x64xf32>
    %362 = tpu.matmul %325, %9, %cst_100 {dimension_numbers = #tpu.dot_dimension_numbers<[1], [0], [0], [1], [0, 0, 1, 1], [], []>} : vector<4x32xf32>, vector<32x64xf32>, vector<4x64xf32> -> vector<4x64xf32>
    %363 = vector.extract_strided_slice %361 {offsets = [0, 0], sizes = [4, 32], strides = [1, 1]} : vector<4x96xf32> to vector<4x32xf32>
    %364 = vector.extract_strided_slice %362 {offsets = [0, 0], sizes = [4, 32], strides = [1, 1]} : vector<4x64xf32> to vector<4x32xf32>
    %365 = arith.addf %363, %364 : vector<4x32xf32>
    %366 = arith.negf %365 : vector<4x32xf32>
    %367 = math.exp %366 : vector<4x32xf32>
    %cst_101 = arith.constant 1.000000e+00 : f32
    %368 = vector.broadcast %cst_101 : f32 to vector<4x32xf32>
    %369 = arith.addf %368, %367 : vector<4x32xf32>
    %370 = arith.divf %368, %369 : vector<4x32xf32>
    %371 = vector.extract_strided_slice %361 {offsets = [0, 32], sizes = [4, 32], strides = [1, 1]} : vector<4x96xf32> to vector<4x32xf32>
    %372 = vector.extract_strided_slice %362 {offsets = [0, 32], sizes = [4, 32], strides = [1, 1]} : vector<4x64xf32> to vector<4x32xf32>
    %373 = arith.addf %371, %372 : vector<4x32xf32>
    %374 = arith.negf %373 : vector<4x32xf32>
    %375 = math.exp %374 : vector<4x32xf32>
    %cst_102 = arith.constant 1.000000e+00 : f32
    %376 = vector.broadcast %cst_102 : f32 to vector<4x32xf32>
    %377 = arith.addf %376, %375 : vector<4x32xf32>
    %378 = arith.divf %376, %377 : vector<4x32xf32>
    %379 = arith.mulf %370, %325 : vector<4x32xf32>
    %cst_103 = arith.constant dense<0.000000e+00> : vector<4x32xf32>
    %380 = tpu.matmul %379, %10, %cst_103 {dimension_numbers = #tpu.dot_dimension_numbers<[1], [0], [0], [1], [0, 0, 1, 1], [], []>} : vector<4x32xf32>, vector<32x32xf32>, vector<4x32xf32> -> vector<4x32xf32>
    %381 = vector.extract_strided_slice %361 {offsets = [0, 64], sizes = [4, 32], strides = [1, 1]} : vector<4x96xf32> to vector<4x32xf32>
    %382 = arith.addf %381, %380 : vector<4x32xf32>
    %383 = math.tanh %382 : vector<4x32xf32>
    %cst_104 = arith.constant 1.000000e+00 : f32
    %384 = vector.broadcast %cst_104 : f32 to vector<4x32xf32>
    %385 = arith.subf %384, %378 : vector<4x32xf32>
    %386 = arith.mulf %385, %383 : vector<4x32xf32>
    %387 = arith.mulf %378, %325 : vector<4x32xf32>
    %388 = arith.addf %386, %387 : vector<4x32xf32>
    %389 = arith.index_cast %c5_i32 : i32 to index
    %c0_105 = arith.constant 0 : index
    %c0_106 = arith.constant 0 : index
    %390 = vector.load %arg10[%389, %c0_105, %c0_106] : memref<8x4x32xf32, #tpu.memory_space<vmem>>, vector<1x4x32xf32>
    %391 = vector.shape_cast %390 : vector<1x4x32xf32> to vector<4x32xf32>
    %392 = vector.shape_cast %388 : vector<4x32xf32> to vector<1x4x32xf32>
    tpu.vector_store %arg10[%389, %c0_105, %c0_106], %392 {strides = array<i32>} : memref<8x4x32xf32, #tpu.memory_space<vmem>>, vector<1x4x32xf32>,
    %c6_i32 = arith.constant 6 : i32
    %393 = arith.index_cast %c6_i32 : i32 to index
    %c0_107 = arith.constant 0 : index
    %c0_108 = arith.constant 0 : index
    %394 = vector.load %arg2[%393, %c0_107, %c0_108] : memref<8x4x96xf32, #tpu.memory_space<vmem>>, vector<1x4x96xf32>
    %395 = vector.shape_cast %394 : vector<1x4x96xf32> to vector<4x96xf32>
    %cst_109 = arith.constant dense<0.000000e+00> : vector<4x64xf32>
    %396 = tpu.matmul %359, %3, %cst_109 {dimension_numbers = #tpu.dot_dimension_numbers<[1], [0], [0], [1], [0, 0, 1, 1], [], []>} : vector<4x32xf32>, vector<32x64xf32>, vector<4x64xf32> -> vector<4x64xf32>
    %397 = vector.extract_strided_slice %395 {offsets = [0, 0], sizes = [4, 32], strides = [1, 1]} : vector<4x96xf32> to vector<4x32xf32>
    %398 = vector.extract_strided_slice %396 {offsets = [0, 0], sizes = [4, 32], strides = [1, 1]} : vector<4x64xf32> to vector<4x32xf32>
    %399 = arith.addf %397, %398 : vector<4x32xf32>
    %400 = arith.negf %399 : vector<4x32xf32>
    %401 = math.exp %400 : vector<4x32xf32>
    %cst_110 = arith.constant 1.000000e+00 : f32
    %402 = vector.broadcast %cst_110 : f32 to vector<4x32xf32>
    %403 = arith.addf %402, %401 : vector<4x32xf32>
    %404 = arith.divf %402, %403 : vector<4x32xf32>
    %405 = vector.extract_strided_slice %395 {offsets = [0, 32], sizes = [4, 32], strides = [1, 1]} : vector<4x96xf32> to vector<4x32xf32>
    %406 = vector.extract_strided_slice %396 {offsets = [0, 32], sizes = [4, 32], strides = [1, 1]} : vector<4x64xf32> to vector<4x32xf32>
    %407 = arith.addf %405, %406 : vector<4x32xf32>
    %408 = arith.negf %407 : vector<4x32xf32>
    %409 = math.exp %408 : vector<4x32xf32>
    %cst_111 = arith.constant 1.000000e+00 : f32
    %410 = vector.broadcast %cst_111 : f32 to vector<4x32xf32>
    %411 = arith.addf %410, %409 : vector<4x32xf32>
    %412 = arith.divf %410, %411 : vector<4x32xf32>
    %413 = arith.mulf %404, %359 : vector<4x32xf32>
    %cst_112 = arith.constant dense<0.000000e+00> : vector<4x32xf32>
    %414 = tpu.matmul %413, %4, %cst_112 {dimension_numbers = #tpu.dot_dimension_numbers<[1], [0], [0], [1], [0, 0, 1, 1], [], []>} : vector<4x32xf32>, vector<32x32xf32>, vector<4x32xf32> -> vector<4x32xf32>
    %415 = vector.extract_strided_slice %395 {offsets = [0, 64], sizes = [4, 32], strides = [1, 1]} : vector<4x96xf32> to vector<4x32xf32>
    %416 = arith.addf %415, %414 : vector<4x32xf32>
    %417 = math.tanh %416 : vector<4x32xf32>
    %cst_113 = arith.constant 1.000000e+00 : f32
    %418 = vector.broadcast %cst_113 : f32 to vector<4x32xf32>
    %419 = arith.subf %418, %412 : vector<4x32xf32>
    %420 = arith.mulf %419, %417 : vector<4x32xf32>
    %421 = arith.mulf %412, %359 : vector<4x32xf32>
    %422 = arith.addf %420, %421 : vector<4x32xf32>
    %cst_114 = arith.constant dense<0.000000e+00> : vector<4x96xf32>
    %423 = tpu.matmul %422, %5, %cst_114 {dimension_numbers = #tpu.dot_dimension_numbers<[1], [0], [0], [1], [0, 0, 1, 1], [], []>} : vector<4x32xf32>, vector<32x96xf32>, vector<4x96xf32> -> vector<4x96xf32>
    %424 = arith.addf %423, %8 : vector<4x96xf32>
    %cst_115 = arith.constant dense<0.000000e+00> : vector<4x64xf32>
    %425 = tpu.matmul %388, %9, %cst_115 {dimension_numbers = #tpu.dot_dimension_numbers<[1], [0], [0], [1], [0, 0, 1, 1], [], []>} : vector<4x32xf32>, vector<32x64xf32>, vector<4x64xf32> -> vector<4x64xf32>
    %426 = vector.extract_strided_slice %424 {offsets = [0, 0], sizes = [4, 32], strides = [1, 1]} : vector<4x96xf32> to vector<4x32xf32>
    %427 = vector.extract_strided_slice %425 {offsets = [0, 0], sizes = [4, 32], strides = [1, 1]} : vector<4x64xf32> to vector<4x32xf32>
    %428 = arith.addf %426, %427 : vector<4x32xf32>
    %429 = arith.negf %428 : vector<4x32xf32>
    %430 = math.exp %429 : vector<4x32xf32>
    %cst_116 = arith.constant 1.000000e+00 : f32
    %431 = vector.broadcast %cst_116 : f32 to vector<4x32xf32>
    %432 = arith.addf %431, %430 : vector<4x32xf32>
    %433 = arith.divf %431, %432 : vector<4x32xf32>
    %434 = vector.extract_strided_slice %424 {offsets = [0, 32], sizes = [4, 32], strides = [1, 1]} : vector<4x96xf32> to vector<4x32xf32>
    %435 = vector.extract_strided_slice %425 {offsets = [0, 32], sizes = [4, 32], strides = [1, 1]} : vector<4x64xf32> to vector<4x32xf32>
    %436 = arith.addf %434, %435 : vector<4x32xf32>
    %437 = arith.negf %436 : vector<4x32xf32>
    %438 = math.exp %437 : vector<4x32xf32>
    %cst_117 = arith.constant 1.000000e+00 : f32
    %439 = vector.broadcast %cst_117 : f32 to vector<4x32xf32>
    %440 = arith.addf %439, %438 : vector<4x32xf32>
    %441 = arith.divf %439, %440 : vector<4x32xf32>
    %442 = arith.mulf %433, %388 : vector<4x32xf32>
    %cst_118 = arith.constant dense<0.000000e+00> : vector<4x32xf32>
    %443 = tpu.matmul %442, %10, %cst_118 {dimension_numbers = #tpu.dot_dimension_numbers<[1], [0], [0], [1], [0, 0, 1, 1], [], []>} : vector<4x32xf32>, vector<32x32xf32>, vector<4x32xf32> -> vector<4x32xf32>
    %444 = vector.extract_strided_slice %424 {offsets = [0, 64], sizes = [4, 32], strides = [1, 1]} : vector<4x96xf32> to vector<4x32xf32>
    %445 = arith.addf %444, %443 : vector<4x32xf32>
    %446 = math.tanh %445 : vector<4x32xf32>
    %cst_119 = arith.constant 1.000000e+00 : f32
    %447 = vector.broadcast %cst_119 : f32 to vector<4x32xf32>
    %448 = arith.subf %447, %441 : vector<4x32xf32>
    %449 = arith.mulf %448, %446 : vector<4x32xf32>
    %450 = arith.mulf %441, %388 : vector<4x32xf32>
    %451 = arith.addf %449, %450 : vector<4x32xf32>
    %452 = arith.index_cast %c6_i32 : i32 to index
    %c0_120 = arith.constant 0 : index
    %c0_121 = arith.constant 0 : index
    %453 = vector.load %arg10[%452, %c0_120, %c0_121] : memref<8x4x32xf32, #tpu.memory_space<vmem>>, vector<1x4x32xf32>
    %454 = vector.shape_cast %453 : vector<1x4x32xf32> to vector<4x32xf32>
    %455 = vector.shape_cast %451 : vector<4x32xf32> to vector<1x4x32xf32>
    tpu.vector_store %arg10[%452, %c0_120, %c0_121], %455 {strides = array<i32>} : memref<8x4x32xf32, #tpu.memory_space<vmem>>, vector<1x4x32xf32>,
    %c7_i32 = arith.constant 7 : i32
    %456 = arith.index_cast %c7_i32 : i32 to index
    %c0_122 = arith.constant 0 : index
    %c0_123 = arith.constant 0 : index
    %457 = vector.load %arg2[%456, %c0_122, %c0_123] : memref<8x4x96xf32, #tpu.memory_space<vmem>>, vector<1x4x96xf32>
    %458 = vector.shape_cast %457 : vector<1x4x96xf32> to vector<4x96xf32>
    %cst_124 = arith.constant dense<0.000000e+00> : vector<4x64xf32>
    %459 = tpu.matmul %422, %3, %cst_124 {dimension_numbers = #tpu.dot_dimension_numbers<[1], [0], [0], [1], [0, 0, 1, 1], [], []>} : vector<4x32xf32>, vector<32x64xf32>, vector<4x64xf32> -> vector<4x64xf32>
    %460 = vector.extract_strided_slice %458 {offsets = [0, 0], sizes = [4, 32], strides = [1, 1]} : vector<4x96xf32> to vector<4x32xf32>
    %461 = vector.extract_strided_slice %459 {offsets = [0, 0], sizes = [4, 32], strides = [1, 1]} : vector<4x64xf32> to vector<4x32xf32>
    %462 = arith.addf %460, %461 : vector<4x32xf32>
    %463 = arith.negf %462 : vector<4x32xf32>
    %464 = math.exp %463 : vector<4x32xf32>
    %cst_125 = arith.constant 1.000000e+00 : f32
    %465 = vector.broadcast %cst_125 : f32 to vector<4x32xf32>
    %466 = arith.addf %465, %464 : vector<4x32xf32>
    %467 = arith.divf %465, %466 : vector<4x32xf32>
    %468 = vector.extract_strided_slice %458 {offsets = [0, 32], sizes = [4, 32], strides = [1, 1]} : vector<4x96xf32> to vector<4x32xf32>
    %469 = vector.extract_strided_slice %459 {offsets = [0, 32], sizes = [4, 32], strides = [1, 1]} : vector<4x64xf32> to vector<4x32xf32>
    %470 = arith.addf %468, %469 : vector<4x32xf32>
    %471 = arith.negf %470 : vector<4x32xf32>
    %472 = math.exp %471 : vector<4x32xf32>
    %cst_126 = arith.constant 1.000000e+00 : f32
    %473 = vector.broadcast %cst_126 : f32 to vector<4x32xf32>
    %474 = arith.addf %473, %472 : vector<4x32xf32>
    %475 = arith.divf %473, %474 : vector<4x32xf32>
    %476 = arith.mulf %467, %422 : vector<4x32xf32>
    %cst_127 = arith.constant dense<0.000000e+00> : vector<4x32xf32>
    %477 = tpu.matmul %476, %4, %cst_127 {dimension_numbers = #tpu.dot_dimension_numbers<[1], [0], [0], [1], [0, 0, 1, 1], [], []>} : vector<4x32xf32>, vector<32x32xf32>, vector<4x32xf32> -> vector<4x32xf32>
    %478 = vector.extract_strided_slice %458 {offsets = [0, 64], sizes = [4, 32], strides = [1, 1]} : vector<4x96xf32> to vector<4x32xf32>
    %479 = arith.addf %478, %477 : vector<4x32xf32>
    %480 = math.tanh %479 : vector<4x32xf32>
    %cst_128 = arith.constant 1.000000e+00 : f32
    %481 = vector.broadcast %cst_128 : f32 to vector<4x32xf32>
    %482 = arith.subf %481, %475 : vector<4x32xf32>
    %483 = arith.mulf %482, %480 : vector<4x32xf32>
    %484 = arith.mulf %475, %422 : vector<4x32xf32>
    %485 = arith.addf %483, %484 : vector<4x32xf32>
    %cst_129 = arith.constant dense<0.000000e+00> : vector<4x96xf32>
    %486 = tpu.matmul %485, %5, %cst_129 {dimension_numbers = #tpu.dot_dimension_numbers<[1], [0], [0], [1], [0, 0, 1, 1], [], []>} : vector<4x32xf32>, vector<32x96xf32>, vector<4x96xf32> -> vector<4x96xf32>
    %487 = arith.addf %486, %8 : vector<4x96xf32>
    %cst_130 = arith.constant dense<0.000000e+00> : vector<4x64xf32>
    %488 = tpu.matmul %451, %9, %cst_130 {dimension_numbers = #tpu.dot_dimension_numbers<[1], [0], [0], [1], [0, 0, 1, 1], [], []>} : vector<4x32xf32>, vector<32x64xf32>, vector<4x64xf32> -> vector<4x64xf32>
    %489 = vector.extract_strided_slice %487 {offsets = [0, 0], sizes = [4, 32], strides = [1, 1]} : vector<4x96xf32> to vector<4x32xf32>
    %490 = vector.extract_strided_slice %488 {offsets = [0, 0], sizes = [4, 32], strides = [1, 1]} : vector<4x64xf32> to vector<4x32xf32>
    %491 = arith.addf %489, %490 : vector<4x32xf32>
    %492 = arith.negf %491 : vector<4x32xf32>
    %493 = math.exp %492 : vector<4x32xf32>
    %cst_131 = arith.constant 1.000000e+00 : f32
    %494 = vector.broadcast %cst_131 : f32 to vector<4x32xf32>
    %495 = arith.addf %494, %493 : vector<4x32xf32>
    %496 = arith.divf %494, %495 : vector<4x32xf32>
    %497 = vector.extract_strided_slice %487 {offsets = [0, 32], sizes = [4, 32], strides = [1, 1]} : vector<4x96xf32> to vector<4x32xf32>
    %498 = vector.extract_strided_slice %488 {offsets = [0, 32], sizes = [4, 32], strides = [1, 1]} : vector<4x64xf32> to vector<4x32xf32>
    %499 = arith.addf %497, %498 : vector<4x32xf32>
    %500 = arith.negf %499 : vector<4x32xf32>
    %501 = math.exp %500 : vector<4x32xf32>
    %cst_132 = arith.constant 1.000000e+00 : f32
    %502 = vector.broadcast %cst_132 : f32 to vector<4x32xf32>
    %503 = arith.addf %502, %501 : vector<4x32xf32>
    %504 = arith.divf %502, %503 : vector<4x32xf32>
    %505 = arith.mulf %496, %451 : vector<4x32xf32>
    %cst_133 = arith.constant dense<0.000000e+00> : vector<4x32xf32>
    %506 = tpu.matmul %505, %10, %cst_133 {dimension_numbers = #tpu.dot_dimension_numbers<[1], [0], [0], [1], [0, 0, 1, 1], [], []>} : vector<4x32xf32>, vector<32x32xf32>, vector<4x32xf32> -> vector<4x32xf32>
    %507 = vector.extract_strided_slice %487 {offsets = [0, 64], sizes = [4, 32], strides = [1, 1]} : vector<4x96xf32> to vector<4x32xf32>
    %508 = arith.addf %507, %506 : vector<4x32xf32>
    %509 = math.tanh %508 : vector<4x32xf32>
    %cst_134 = arith.constant 1.000000e+00 : f32
    %510 = vector.broadcast %cst_134 : f32 to vector<4x32xf32>
    %511 = arith.subf %510, %504 : vector<4x32xf32>
    %512 = arith.mulf %511, %509 : vector<4x32xf32>
    %513 = arith.mulf %504, %451 : vector<4x32xf32>
    %514 = arith.addf %512, %513 : vector<4x32xf32>
    %515 = arith.index_cast %c7_i32 : i32 to index
    %c0_135 = arith.constant 0 : index
    %c0_136 = arith.constant 0 : index
    %516 = vector.load %arg10[%515, %c0_135, %c0_136] : memref<8x4x32xf32, #tpu.memory_space<vmem>>, vector<1x4x32xf32>
    %517 = vector.shape_cast %516 : vector<1x4x32xf32> to vector<4x32xf32>
    %518 = vector.shape_cast %514 : vector<4x32xf32> to vector<1x4x32xf32>
    tpu.vector_store %arg10[%515, %c0_135, %c0_136], %518 {strides = array<i32>} : memref<8x4x32xf32, #tpu.memory_space<vmem>>, vector<1x4x32xf32>,
    %c8_i32 = arith.constant 8 : i32
    %c0_137 = arith.constant 0 : index
    %c0_138 = arith.constant 0 : index
    %c0_139 = arith.constant 0 : index
    %519 = vector.load %arg11[%c0_137, %c0_138, %c0_139] : memref<2x4x32xf32, #tpu.memory_space<vmem>>, vector<1x4x32xf32>
    %520 = vector.shape_cast %519 : vector<1x4x32xf32> to vector<4x32xf32>
    %521 = vector.shape_cast %485 : vector<4x32xf32> to vector<1x4x32xf32>
    tpu.vector_store %arg11[%c0_137, %c0_138, %c0_139], %521 {strides = array<i32>} : memref<2x4x32xf32, #tpu.memory_space<vmem>>, vector<1x4x32xf32>,
    %c1_140 = arith.constant 1 : index
    %c0_141 = arith.constant 0 : index
    %c0_142 = arith.constant 0 : index
    %522 = vector.load %arg11[%c1_140, %c0_141, %c0_142] : memref<2x4x32xf32, #tpu.memory_space<vmem>>, vector<1x4x32xf32>
    %523 = vector.shape_cast %522 : vector<1x4x32xf32> to vector<4x32xf32>
    %524 = vector.shape_cast %514 : vector<4x32xf32> to vector<1x4x32xf32>
    tpu.vector_store %arg11[%c1_140, %c0_141, %c0_142], %524 {strides = array<i32>} : memref<2x4x32xf32, #tpu.memory_space<vmem>>, vector<1x4x32xf32>,
    return
  }
  func.func @transform_0(%arg0: i32, %arg1: i32) -> (i32, i32, i32) {
    %c0_i32 = arith.constant 0 : i32
    %c0_i32_0 = arith.constant 0 : i32
    return %arg1, %arg0, %c0_i32 : i32, i32, i32
  }
  func.func @transform_1(%arg0: i32, %arg1: i32) -> (i32, i32, i32) {
    %c0_i32 = arith.constant 0 : i32
    %c0_i32_0 = arith.constant 0 : i32
    %c0_i32_1 = arith.constant 0 : i32
    return %c0_i32, %arg0, %c0_i32_0 : i32, i32, i32
  }
  func.func @transform_2(%arg0: i32, %arg1: i32) -> (i32, i32) {
    %c0_i32 = arith.constant 0 : i32
    %c0_i32_0 = arith.constant 0 : i32
    %c0_i32_1 = arith.constant 0 : i32
    return %c0_i32, %c0_i32_0 : i32, i32
  }
  func.func @transform_3(%arg0: i32, %arg1: i32) -> (i32, i32) {
    %c0_i32 = arith.constant 0 : i32
    %c0_i32_0 = arith.constant 0 : i32
    %c0_i32_1 = arith.constant 0 : i32
    return %c0_i32, %c0_i32_0 : i32, i32
  }
  func.func @transform_4(%arg0: i32, %arg1: i32) -> (i32, i32) {
    %c0_i32 = arith.constant 0 : i32
    %c0_i32_0 = arith.constant 0 : i32
    %c0_i32_1 = arith.constant 0 : i32
    return %c0_i32, %c0_i32_0 : i32, i32
  }
  func.func @transform_5(%arg0: i32, %arg1: i32) -> (i32, i32) {
    %c0_i32 = arith.constant 0 : i32
    %c0_i32_0 = arith.constant 0 : i32
    %c0_i32_1 = arith.constant 0 : i32
    return %c0_i32, %c0_i32_0 : i32, i32
  }
  func.func @transform_6(%arg0: i32, %arg1: i32) -> (i32, i32) {
    %c0_i32 = arith.constant 0 : i32
    %c0_i32_0 = arith.constant 0 : i32
    %c0_i32_1 = arith.constant 0 : i32
    return %c0_i32, %c0_i32_0 : i32, i32
  }
  func.func @transform_7(%arg0: i32, %arg1: i32) -> (i32, i32) {
    %c0_i32 = arith.constant 0 : i32
    %c0_i32_0 = arith.constant 0 : i32
    %c0_i32_1 = arith.constant 0 : i32
    return %c0_i32, %c0_i32_0 : i32, i32
  }
  func.func @transform_8(%arg0: i32, %arg1: i32) -> (i32, i32, i32) {
    %c0_i32 = arith.constant 0 : i32
    %c0_i32_0 = arith.constant 0 : i32
    return %arg1, %arg0, %c0_i32 : i32, i32, i32
  }
}

</mosaic_0001>

<bundles_post_ra>
// kernel: tpu_custom_call.1
= control target key start
LH: loop header
LB: loop body
LE: loop exit
PB: predicated region body
PF: predicated region fallthrough
CT: control target
= control target key end

     0   :  { %13 = vsyncpa [#allocation4], 0  ;;  %s5380_s0 = inlined_call_operand.hbm [shape: f32[8,4,96], index: 0, kind: input, shape index: {}]   ;;  %s5381_s1 = inlined_call_operand.hbm [shape: f32[2,4,32], index: 1, kind: input, shape index: {}]   ;;  %s5382_s2 = inlined_call_operand.hbm [shape: f32[32,64], index: 2, kind: input, shape index: {}]   ;;  %s5383_s3 = inlined_call_operand.hbm [shape: f32[32,32], index: 3, kind: input, shape index: {}]   ;;  %s5384_s4 = inlined_call_operand.hbm [shape: f32[32,96], index: 4, kind: input, shape index: {}]   ;;  %s5385_s5 = inlined_call_operand.vmem [shape: f32[1,96], index: 5, kind: input, shape index: {}]   ;;  %s5386_s6 = inlined_call_operand.hbm [shape: f32[32,64], index: 6, kind: input, shape index: {}]   ;;  %s5387_s7 = inlined_call_operand.hbm [shape: f32[32,32], index: 7, kind: input, shape index: {}]   ;;  %s5388_s8 = inlined_call_operand.hbm [shape: f32[8,4,32], index: 8, kind: output, shape index: {}]  }
   0x1   :  { %14 = vsyncpa [#allocation7], 0 }
   0x2   :  { %15 = vsyncpa [#allocation10], 0 }
   0x3   :  { %16 = vsyncpa [#allocation13], 0 }
   0x4   :  { %17 = vsyncpa [#allocation5], 0  ;;  %s4761_s27 = smov [#allocation6]   ;;  %s4575_s9 = scalar_lea.hbm %s5381_s1, 128 }
   0x5   :  { %s35_s28 = sshll.u32 %s4761_s27, 4  ;;  %p4576_p0 = scmp.ne.s32.totalorder %s5381_s1, %s4575_s9  ;;  %s36_s28 = int_to_ptr.vmem [resolvable:$true] %s35_s28 }
   0x6   :  { %p4579_p1 = scmp.lt.u32.totalorder %s4575_s9, %s5381_s1 }
   0x8   :  { %p4581_p2 = pnand %p4579_p1, %p4576_p0 }
   0xa   :  { %4584 = shalt.err (!%p4581_p2)
}
   0xb   :  { %s4585_s14 = scalar_lea.vmem %s36_s28, 128  ;;  %p4590_p4 = scmp.lt.s32.totalorder %s36_s28, %s36_s28 }
   0xc   :  { %p4586_p3 = scmp.ne.s32.totalorder %s36_s28, %s4585_s14  ;;  %p4591_p5 = scmp.lt.s32.totalorder %s4585_s14, %s4585_s14 }
   0xe   :  { %p4592_p6 = por %p4591_p5, %p4590_p4 }
  0x10   :  { %p4593_p7 = pnand %p4592_p6, %p4586_p3 }
  0x12   :  { %4596 = shalt.err (!%p4593_p7)
}
  0x13   :  { %s4762_s15 = smov 64   ;;  %s4763_s16 = smov 4  }
  0x14   :  { %41 = dma.hbm_to_vmem [thread:$0]  %s5381_s1, 128, %s36_s28, [#allocation7], %s4762_s15, %s4762_s15, %s4763_s16  }
  0x15   :  { %s4764_s19 = smov [#allocation9]   ;;  %s4765_s21 = smov [#allocation12]  }
  0x16   :  { %s59_s20 = sshll.u32 %s4764_s19, 4  ;;  %s85_s22 = sshll.u32 %s4765_s21, 4  ;;  %s60_s20 = int_to_ptr.vmem [resolvable:$true] %s59_s20  ;;  %s86_s22 = int_to_ptr.vmem [resolvable:$true] %s85_s22 }
  0x17   :  { %s4597_s25 = scalar_lea.hbm %s5383_s3, 512 }
  0x18   :  { %p4598_p8 = scmp.ne.s32.totalorder %s5383_s3, %s4597_s25  ;;  %p4601_p9 = scmp.lt.u32.totalorder %s4597_s25, %s5383_s3 }
  0x1a   :  { %p4603_p10 = pnand %p4601_p9, %p4598_p8 }
  0x1c   :  { %4606 = shalt.err (!%p4603_p10)
}
  0x1d   :  { %s4607_s1 = scalar_lea.vmem %s60_s20, 512  ;;  %p4612_p12 = scmp.lt.s32.totalorder %s60_s20, %s60_s20 }
  0x1e   :  { %p4608_p11 = scmp.ne.s32.totalorder %s60_s20, %s4607_s1  ;;  %p4613_p13 = scmp.lt.s32.totalorder %s4607_s1, %s4607_s1 }
  0x20   :  { %p4614_p0 = por %p4613_p13, %p4612_p12 }
  0x22   :  { %p4615_p1 = pnand %p4614_p0, %p4608_p11 }
  0x24   :  { %4618 = shalt.err (!%p4615_p1)
}
  0x25   :  { %s4766_s28 = smov 128   ;;  %s4767_s9 = smov 8  }
  0x26   :  { %65 = dma.hbm_to_vmem [thread:$0]  %s5383_s3, 512, %s60_s20, [#allocation10], %s4766_s28, %s4766_s28, %s4767_s9  }
  0x27   :  { %s4619_s14 = scalar_lea.hbm %s5386_s6, 512 }
  0x28   :  { %p4620_p2 = scmp.ne.s32.totalorder %s5386_s6, %s4619_s14  ;;  %p4623_p3 = scmp.lt.u32.totalorder %s4619_s14, %s5386_s6 }
  0x2a   :  { %p4625_p4 = pnand %p4623_p3, %p4620_p2 }
  0x2c   :  { %4628 = shalt.err (!%p4625_p4)
}
  0x2d   :  { %s4629_s23 = scalar_lea.vmem %s86_s22, 512  ;;  %p4634_p6 = scmp.lt.s32.totalorder %s86_s22, %s86_s22 }
  0x2e   :  { %p4630_p5 = scmp.ne.s32.totalorder %s86_s22, %s4629_s23  ;;  %p4635_p7 = scmp.lt.s32.totalorder %s4629_s23, %s4629_s23 }
  0x30   :  { %p4636_p8 = por %p4635_p7, %p4634_p6 }
  0x32   :  { %p4637_p9 = pnand %p4636_p8, %p4630_p5 }
  0x34   :  { %4640 = shalt.err (!%p4637_p9)
}
  0x35   :  { %91 = dma.hbm_to_vmem [thread:$0]  %s5386_s6, 512, %s86_s22, [#allocation13], %s4766_s28, %s4766_s28, %s4767_s9  }
  0x36   :  { %s4768_s24 = smov [#allocation3]   ;;  %s4769_s26 = smov [#allocation8]  }
  0x37   :  { %s23_s25 = sshll.u32 %s4768_s24, 4  ;;  %s47_s27 = sshll.u32 %s4769_s26, 4  ;;  %s24_s25 = int_to_ptr.vmem [resolvable:$true] %s23_s25  ;;  %s48_s27 = int_to_ptr.vmem [resolvable:$true] %s47_s27 }
  0x38   :  { %s4641_s1 = scalar_lea.hbm %s5380_s0, 512 }
  0x39   :  { %p4642_p10 = scmp.ne.s32.totalorder %s5380_s0, %s4641_s1  ;;  %p4645_p11 = scmp.lt.u32.totalorder %s4641_s1, %s5380_s0 }
  0x3b   :  { %p4647_p12 = pnand %p4645_p11, %p4642_p10 }
  0x3d   :  { %4650 = shalt.err (!%p4647_p12)
}
  0x3e   :  { %s4651_s6 = scalar_lea.vmem %s24_s25, 512  ;;  %p4656_p0 = scmp.lt.s32.totalorder %s24_s25, %s24_s25 }
  0x3f   :  { %p4652_p13 = scmp.ne.s32.totalorder %s24_s25, %s4651_s6  ;;  %p4657_p1 = scmp.lt.s32.totalorder %s4651_s6, %s4651_s6 }
  0x41   :  { %p4658_p2 = por %p4657_p1, %p4656_p0 }
  0x43   :  { %p4659_p3 = pnand %p4658_p2, %p4652_p13 }
  0x45   :  { %4662 = shalt.err (!%p4659_p3)
}
  0x46   :  { %29 = dma.hbm_to_vmem [thread:$0]  %s5380_s0, 512, %s24_s25, [#allocation4], %s4762_s15, %s4762_s15, %s4763_s16  }
  0x47   :  { %s4663_s19 = scalar_lea.hbm %s5382_s2, 512 }
  0x48   :  { %p4664_p4 = scmp.ne.s32.totalorder %s5382_s2, %s4663_s19  ;;  %p4667_p5 = scmp.lt.u32.totalorder %s4663_s19, %s5382_s2 }
  0x4a   :  { %p4669_p6 = pnand %p4667_p5, %p4664_p4 }
  0x4c   :  { %4672 = shalt.err (!%p4669_p6)
}
  0x4d   :  { %s4673_s24 = scalar_lea.vmem %s48_s27, 512  ;;  %p4678_p8 = scmp.lt.s32.totalorder %s48_s27, %s48_s27 }
  0x4e   :  { %p4674_p7 = scmp.ne.s32.totalorder %s48_s27, %s4673_s24  ;;  %p4679_p9 = scmp.lt.s32.totalorder %s4673_s24, %s4673_s24 }
  0x50   :  { %p4680_p10 = por %p4679_p9, %p4678_p8 }
  0x52   :  { %p4681_p11 = pnand %p4680_p10, %p4674_p7 }
  0x54   :  { %4684 = shalt.err (!%p4681_p11)
}
  0x55   :  { %53 = dma.hbm_to_vmem [thread:$0]  %s5382_s2, 512, %s48_s27, [#allocation7], %s4766_s28, %s4766_s28, %s4767_s9  }
  0x56   :  { %s4770_s26 = smov [#allocation11]   ;;  %s4771_s30 = smov [#allocation14]  }
  0x57   :  { %s71_s29 = sshll.u32 %s4770_s26, 4  ;;  %s97_s1 = sshll.u32 %s4771_s30, 4  ;;  %s72_s29 = int_to_ptr.vmem [resolvable:$true] %s71_s29  ;;  %s98_s1 = int_to_ptr.vmem [resolvable:$true] %s97_s1 }
  0x58   :  { %s4685_s12 = scalar_lea.hbm %s5384_s4, 512 }
  0x59   :  { %p4686_p12 = scmp.ne.s32.totalorder %s5384_s4, %s4685_s12  ;;  %p4689_p13 = scmp.lt.u32.totalorder %s4685_s12, %s5384_s4 }
  0x5b   :  { %p4691_p0 = pnand %p4689_p13, %p4686_p12 }
  0x5d   :  { %4694 = shalt.err (!%p4691_p0)
}
  0x5e   :  { %s4695_s2 = scalar_lea.vmem %s72_s29, 512  ;;  %p4700_p2 = scmp.lt.s32.totalorder %s72_s29, %s72_s29 }
  0x5f   :  { %p4696_p1 = scmp.ne.s32.totalorder %s72_s29, %s4695_s2  ;;  %p4701_p3 = scmp.lt.s32.totalorder %s4695_s2, %s4695_s2 }
  0x61   :  { %p4702_p4 = por %p4701_p3, %p4700_p2 }
  0x63   :  { %p4703_p5 = pnand %p4702_p4, %p4696_p1 }
  0x65   :  { %4706 = shalt.err (!%p4703_p5)
}
  0x66   :  { %77 = dma.hbm_to_vmem [thread:$0]  %s5384_s4, 512, %s72_s29, [#allocation10], %s4766_s28, %s4766_s28, %s4767_s9  }
  0x67   :  { %s4707_s21 = scalar_lea.hbm %s5387_s7, 512 }
  0x68   :  { %p4708_p6 = scmp.ne.s32.totalorder %s5387_s7, %s4707_s21  ;;  %p4711_p7 = scmp.lt.u32.totalorder %s4707_s21, %s5387_s7 }
  0x6a   :  { %p4713_p8 = pnand %p4711_p7, %p4708_p6 }
  0x6c   :  { %4716 = shalt.err (!%p4713_p8)
}
  0x6d   :  { %s4717_s0 = scalar_lea.vmem %s98_s1, 512  ;;  %p4722_p10 = scmp.lt.s32.totalorder %s98_s1, %s98_s1 }
  0x6e   :  { %p4718_p9 = scmp.ne.s32.totalorder %s98_s1, %s4717_s0  ;;  %p4723_p11 = scmp.lt.s32.totalorder %s4717_s0, %s4717_s0 }
  0x70   :  { %p4724_p12 = por %p4723_p11, %p4722_p10 }
  0x72   :  { %p4725_p13 = pnand %p4724_p12, %p4718_p9 }
  0x74   :  { %4728 = shalt.err (!%p4725_p13)
}
  0x75   :  { %103 = dma.hbm_to_vmem [thread:$0]  %s5387_s7, 512, %s98_s1, [#allocation13], %s4766_s28, %s4766_s28, %s4767_s9  }
  0x76   :  { %4751 = dma.done.wait [#allocation4], 512  }
  0x77   :  { %4752 = vsyncadd [#allocation4], 4294966784 }
  0x78   :  { %4753 = dma.done.wait [#allocation7], 640  }
  0x79   :  { %4754 = vsyncadd [#allocation7], 4294966656 }
  0x7a   :  { %4755 = dma.done.wait [#allocation10], 1024  }
  0x7b   :  { %4756 = vsyncadd [#allocation10], 4294966272 }
  0x7c   :  { %4757 = dma.done.wait [#allocation13], 1024  }
  0x7d   :  { %4758 = vsyncadd [#allocation13], 4294966272  ;;  %v4772_v0 = vmov 0.0|0.0   ;;  %vm4773_vm0 = vmmov 0   ;;  %v4774_v1 = vmov 0.0   ;;  %vm131_vm1 = vcmask 257024  }
  0x7e   :  { %4221 = vmatprep.subr.bf16.mxu0 %v4772_v0  ;;  %3789 = vmatprep.mubr.msk.f32.mxu0 %vm4773_vm0, %v4774_v1  ;;  %v134_v2 = vld [vmem:[#allocation8] sm:$0xff]  ;;  %v135_v3 = vld [vmem:[#allocation8 + $0x8] sm:$0xff]  ;;  %v136_v4 = vld [vmem:[#allocation8 + $0x10] sm:$0xff]  ;;  %vm165_vm2 = vcmask 261120   ;;  %s4775_s7 = smov 32   ;;  %s4776_s28 = smov 96  }
  0x7f   :  { %4227 = vmatprep.subr.bf16.mxu1 %v4772_v0  ;;  %3800 = vmatprep.mubr.msk.f32.mxu1 %vm4773_vm0, %v4774_v1  ;;  %v4934_v5 = vpack.c.bf16 %v135_v3, %v134_v2  ;;  %v137_v6 = vld [vmem:[#allocation8 + $0x18] sm:$0xff]  ;;  %v138_v10 = vld [vmem:[#allocation9] sm:$0xff]  ;;  %v139_v11 = vld [vmem:[#allocation9 + $0x8] sm:$0xff] }
  0x80   :  { %v129_v7 = vld [vmem:[#allocation6] sm:$0xf]  ;;  %v4938_v8 = vpack.c.bf16 %v137_v6, %v136_v4  ;;  %v140_v12 = vld [vmem:[#allocation9 + $0x10] sm:$0xff]  ;;  %v4947_v13 = vpack.c.bf16 %v139_v11, %v138_v10  ;;  %v153_v29 = vld [vmem:[#allocation12] sm:$0xff] }
  0x81   :  { %132 = vst.msk [vmem:[#allocation2] sm:$0xf] %vm131_vm1, %v129_v7  ;;  %4223 = vmatpush3.bf16.msra.mxu0 %v4934_v5  ;;  %v141_v14 = vld [vmem:[#allocation9 + $0x18] sm:$0xff]  ;;  %v154_v30 = vld [vmem:[#allocation12 + $0x8] sm:$0xff]  ;;  %v155_v31 = vld [vmem:[#allocation12 + $0x10] sm:$0xff] }
  0x82   :  { %4224 = vmatprep.subr.bf16.mxu0 %v4772_v0  ;;  %4229 = vmatpush3.bf16.msra.mxu1 %v4947_v13  ;;  %v4950_v15 = vpack.c.bf16 %v141_v14, %v140_v12  ;;  %v164_v16 = vld [vmem:[#allocation3] sm:$0xf]  ;;  %v4959_v32 = vpack.c.bf16 %v154_v30, %v153_v29  ;;  %v142_v34 = vld [vmem:[#allocation11] sm:$0xff]  ;;  %v143_v35 = vld [vmem:[#allocation11 + $0x8] sm:$0xff] }
  0x83   :  { %4230 = vmatprep.subr.bf16.mxu1 %v4772_v0  ;;  %v156_v33 = vld [vmem:[#allocation12 + $0x18] sm:$0xff]  ;;  %v4961_v36 = vpack.c.bf16 %v143_v35, %v142_v34  ;;  %v144_v38 = vld [vmem:[#allocation11 + $0x10] sm:$0xff]  ;;  %v157_v53 = vld [vmem:[#allocation14] sm:$0xff] }
  0x84   :  { %v130_v37 = vld [vmem:[#allocation6 + $0x4] sm:$0xf]  ;;  %v4964_v40 = vpack.c.bf16 %v156_v33, %v155_v31  ;;  %v158_v54 = vld [vmem:[#allocation14 + $0x8] sm:$0xff]  ;;  %v159_v55 = vld [vmem:[#allocation14 + $0x10] sm:$0xff] }
  0x85   :  { %4226 = vmatpush3.bf16.msra.mxu0 %v4938_v8  ;;  %v145_v39 = vld [vmem:[#allocation11 + $0x18] sm:$0xff]  ;;  %133 = vst.msk [vmem:[#allocation2 + $0x4] sm:$0xf] %vm131_vm1, %v130_v37  ;;  %v5001_v56 = vpack.c.bf16 %v158_v54, %v157_v53  ;;  %v5012_v59 = vld [vmem:[%s5385_s5] ss:$0 sm:$0xff] }
  0x86   :  { %4233 = vmatprep.subr.bf16.mxu0 %v4772_v0  ;;  %4232 = vmatpush3.bf16.msra.mxu1 %v4950_v15  ;;  %v4969_v41 = vpack.c.bf16 %v145_v39, %v144_v38  ;;  %v160_v57 = vld [vmem:[#allocation14 + $0x18] sm:$0xff]  ;;  %v1006_v54 = vld [vmem:[#allocation3 + $0x8] sm:$0xf] }
  0x87   :  { %4239 = vmatprep.subr.bf16.mxu1 %v4772_v0  ;;  %v5004_v58 = vpack.c.bf16 %v160_v57, %v159_v55  ;;  %v590_v60 = vld [vmem:[#allocation3 + $0x4] sm:$0xf] }
  0x88   :  { %v161_v9 = vld [vmem:[#allocation2] sm:$0xf] }
  0x89   :  { %3790 = vmatmul.mubr.msk.f32.vlgmr.msra.gmra.mrb[0].mxu0 %vm165_vm2, %v161_v9  ;;  %332 = vrot.lane.b32.xlu1 %v161_v9, %s4775_s7 }
  0x8a   :  { %3811 = vmatprep.mubr.msk.f32.mxu0 %vm4773_vm0, %v4774_v1  ;;  %4235 = vmatpush3.bf16.msra.mxu0 %v4961_v36 }
  0x8b   :  { %4236 = vmatprep.subr.bf16.mxu0 %v4772_v0 }
  0x8c   :  { %v4977_v43 = vld [vmem:[#allocation2 + $0x4] sm:$0xf] }
  0x8e   :  { %4238 = vmatpush3.bf16.msra.mxu0 %v4969_v41 }
  0x8f   :  { %4245 = vmatprep.subr.bf16.mxu0 %v4772_v0 }
  0xfb   :  { %v333_v44 = vpop.permute.xlu1 %332 }
 0x15c   :  { %v235_v17 = vpop.f32.mrb[0].mxu0 }
 0x15d   :  { %v239_v18 = vadd.f32 %v235_v17, %v164_v16  ;;  %v3791_v19 = vpop.f32.mrb[1].mxu0 }
 0x15f   :  { %v3526_v20 = vmul.f32 -1.442695, %v239_v18 }
 0x161   :  { %4478 = vpow2.f32 %v3526_v20 }
 0x16b   :  { %v4479_v21 = vpop.eup %4478 }
 0x16c   :  { %v243_v22 = vadd.f32 1.0, %v4479_v21 }
 0x16e   :  { %4480 = vrcp.f32 %v243_v22 }
 0x178   :  { %v4481_v23 = vpop.eup %4480 }
 0x179   :  { %v246_v24 = vmul.f32 %v4481_v23, %v161_v9  ;;  %v326_v45 = vsub.f32 1.0, %v4481_v23  ;;  %v335_v47 = vmul.f32 %v4481_v23, %v333_v44 }
 0x17b   :  { %3801 = vmatmul.mubr.msk.f32.vlgmr.msra.gmra.mrb[0].mxu1 %vm165_vm2, %v246_v24 }
 0x17c   :  { %3822 = vmatprep.mubr.msk.f32.mxu1 %vm4773_vm0, %v4774_v1  ;;  %4241 = vmatpush3.bf16.msra.mxu1 %v4959_v32 }
 0x17d   :  { %4242 = vmatprep.subr.bf16.mxu1 %v4772_v0 }
 0x180   :  { %4244 = vmatpush3.bf16.msra.mxu1 %v4964_v40 }
 0x181   :  { %4251 = vmatprep.subr.bf16.mxu1 %v4772_v0 }
 0x183   :  { %3823 = vmatmul.mubr.msk.f32.vlgmr.msra.gmra.mrb[2].mxu1 %vm165_vm2, %v4977_v43 }
 0x184   :  { %4253 = vmatpush3.bf16.msra.mxu1 %v4934_v5  ;;  %3844 = vmatprep.mubr.msk.f32.mxu1 %vm4773_vm0, %v4774_v1 }
 0x185   :  { %4254 = vmatprep.subr.bf16.mxu1 %v4772_v0 }
 0x188   :  { %4256 = vmatpush3.bf16.msra.mxu1 %v4938_v8 }
 0x189   :  { %4263 = vmatprep.subr.bf16.mxu1 %v4772_v0 }
 0x24e   :  { %v316_v25 = vpop.f32.mrb[0].mxu1 }
 0x24f   :  { %321 = vrot.lane.b32.xlu0 %v316_v25, %s4762_s15  ;;  %v3802_v26 = vpop.f32.mrb[1].mxu1 }
 0x256   :  { %v481_v50 = vpop.f32.mrb[2].mxu1 }
 0x257   :  { %v3824_v51 = vpop.f32.mrb[3].mxu1 }
 0x2c1   :  { %v322_v27 = vpop.permute.xlu0 %321 }
 0x2c2   :  { %v324_v28 = vadd.f32 %v322_v27, %v164_v16 }
 0x2c4   :  { %4482 = vtanh.f32 %v324_v28 }
 0x2ce   :  { %v4483_v42 = vpop.eup %4482 }
 0x2cf   :  { %328 = vrot.lane.b32.xlu0 %v4483_v42, %s4776_s28 }
 0x341   :  { %v329_v46 = vpop.permute.xlu0 %328 }
 0x342   :  { %v331_v48 = vmul.f32 %v329_v46, %v326_v45 }
 0x344   :  { %v4987_v49 = vadd.f32 %v335_v47, %v331_v48 }
 0x346   :  { %338 = vrot.lane.b32.xlu1 %v4987_v49, %s4776_s28 }
 0x3b8   :  { %v339_v52 = vpop.permute.xlu1 %338 }
 0x3b9   :  { %3812 = vmatmul.mubr.msk.f32.vlgmr.msra.gmra.mrb[2].mxu0 %vm165_vm2, %v339_v52  ;;  %3845 = vmatmul.mubr.msk.f32.vlgmr.msra.gmra.mrb[4].mxu1 %vm165_vm2, %v339_v52 }
 0x3ba   :  { %3833 = vmatprep.mubr.msk.f32.mxu0 %vm4773_vm0, %v4774_v1  ;;  %4265 = vmatpush3.bf16.msra.mxu1 %v4961_v36 }
 0x3bb   :  { %4266 = vmatprep.subr.bf16.mxu1 %v4772_v0  ;;  %3866 = vmatprep.mubr.msk.f32.mxu1 %vm4773_vm0, %v4774_v1 }
 0x3bc   :  { %4247 = vmatpush3.bf16.msra.mxu0 %v5001_v56 }
 0x3bd   :  { %4248 = vmatprep.subr.bf16.mxu0 %v4772_v0 }
 0x3be   :  { %4268 = vmatpush3.bf16.msra.mxu1 %v4969_v41 }
 0x3bf   :  { %4275 = vmatprep.subr.bf16.mxu1 %v4772_v0 }
 0x3c0   :  { %4250 = vmatpush3.bf16.msra.mxu0 %v5004_v58 }
 0x3c1   :  { %4257 = vmatprep.subr.bf16.mxu0 %v4772_v0 }
 0x48c   :  { %v408_v61 = vpop.f32.mrb[2].mxu0  ;;  %v657_v62 = vpop.f32.mrb[4].mxu1 }
 0x48d   :  { %v409_v63 = vadd.f32 %v5012_v59, %v408_v61  ;;  %v661_v2 = vadd.f32 %v657_v62, %v590_v60  ;;  %v3813_v3 = vpop.f32.mrb[3].mxu0  ;;  %v3846_v4 = vpop.f32.mrb[5].mxu1 }
 0x48f   :  { %v485_v6 = vadd.f32 %v481_v50, %v409_v63  ;;  %v3533_v9 = vmul.f32 -1.442695, %v661_v2 }
 0x491   :  { %v3530_v7 = vmul.f32 -1.442695, %v485_v6 }
 0x493   :  { %4484 = vpow2.f32 %v3530_v7 }
 0x494   :  { %4486 = vpow2.f32 %v3533_v9 }
 0x49d   :  { %v4485_v10 = vpop.eup %4484 }
 0x49e   :  { %v489_v11 = vadd.f32 1.0, %v4485_v10  ;;  %v4487_v12 = vpop.eup %4486 }
 0x49f   :  { %v665_v14 = vadd.f32 1.0, %v4487_v12 }
 0x4a0   :  { %4488 = vrcp.f32 %v489_v11 }
 0x4a1   :  { %4490 = vrcp.f32 %v665_v14 }
 0x4aa   :  { %v4489_v16 = vpop.eup %4488 }
 0x4ab   :  { %v492_v17 = vmul.f32 %v4489_v16, %v4977_v43  ;;  %v4491_v18 = vpop.eup %4490  ;;  %v572_v37 = vsub.f32 1.0, %v4489_v16 }
 0x4ac   :  { %v669_v19 = vmul.f32 %v4491_v18, %v339_v52  ;;  %v749_v30 = vsub.f32 1.0, %v4491_v18  ;;  %v755_v33 = vmul.f32 %v4491_v18, %v4987_v49 }
 0x4ad   :  { %3834 = vmatmul.mubr.msk.f32.vlgmr.msra.gmra.mrb[4].mxu0 %vm165_vm2, %v492_v17 }
 0x4ae   :  { %4259 = vmatpush3.bf16.msra.mxu0 %v4947_v13  ;;  %3855 = vmatprep.mubr.msk.f32.mxu0 %vm4773_vm0, %v4774_v1 }
 0x4af   :  { %4260 = vmatprep.subr.bf16.mxu0 %v4772_v0 }
 0x4b2   :  { %4262 = vmatpush3.bf16.msra.mxu0 %v4950_v15 }
 0x4b3   :  { %4269 = vmatprep.subr.bf16.mxu0 %v4772_v0 }
 0x4b5   :  { %3856 = vmatmul.mubr.msk.f32.vlgmr.msra.gmra.mrb[6].mxu0 %vm165_vm2, %v669_v19 }
 0x4b6   :  { %4271 = vmatpush3.bf16.msra.mxu0 %v4959_v32  ;;  %3877 = vmatprep.mubr.msk.f32.mxu0 %vm4773_vm0, %v4774_v1 }
 0x4b7   :  { %4272 = vmatprep.subr.bf16.mxu0 %v4772_v0 }
 0x4ba   :  { %4274 = vmatpush3.bf16.msra.mxu0 %v4964_v40 }
 0x4bb   :  { %4281 = vmatprep.subr.bf16.mxu0 %v4772_v0 }
 0x580   :  { %v562_v20 = vpop.f32.mrb[4].mxu0 }
 0x581   :  { %567 = vrot.lane.b32.xlu1 %v562_v20, %s4762_s15  ;;  %v3835_v21 = vpop.f32.mrb[5].mxu0 }
 0x588   :  { %v739_v22 = vpop.f32.mrb[6].mxu0 }
 0x589   :  { %744 = vrot.lane.b32.xlu0 %v739_v22, %s4762_s15  ;;  %v3857_v23 = vpop.f32.mrb[7].mxu0 }
 0x5f3   :  { %v568_v24 = vpop.permute.xlu1 %567 }
 0x5f4   :  { %v570_v25 = vadd.f32 %v568_v24, %v409_v63 }
 0x5f6   :  { %4492 = vtanh.f32 %v570_v25 }
 0x5fb   :  { %v745_v26 = vpop.permute.xlu0 %744 }
 0x5fc   :  { %v747_v27 = vadd.f32 %v745_v26, %v590_v60 }
 0x5fe   :  { %4494 = vtanh.f32 %v747_v27 }
 0x600   :  { %v4493_v28 = vpop.eup %4492 }
 0x601   :  { %574 = vrot.lane.b32.xlu1 %v4493_v28, %s4776_s28 }
 0x608   :  { %v4495_v29 = vpop.eup %4494 }
 0x609   :  { %751 = vrot.lane.b32.xlu0 %v4495_v29, %s4776_s28 }
 0x60d   :  { %578 = vrot.lane.b32.xlu0 %v4977_v43, %s4775_s7 }
 0x673   :  { %v575_v35 = vpop.permute.xlu1 %574 }
 0x674   :  { %v577_v42 = vmul.f32 %v575_v35, %v572_v37 }
 0x67b   :  { %v752_v31 = vpop.permute.xlu0 %751 }
 0x67c   :  { %v754_v34 = vmul.f32 %v752_v31, %v749_v30 }
 0x67e   :  { %v5037_v38 = vadd.f32 %v755_v33, %v754_v34 }
 0x67f   :  { %v579_v39 = vpop.permute.xlu0 %578 }
 0x680   :  { %v581_v44 = vmul.f32 %v4489_v16, %v579_v39  ;;  %758 = vrot.lane.b32.xlu1 %v5037_v38, %s4776_s28 }
 0x682   :  { %v5041_v45 = vadd.f32 %v581_v44, %v577_v42 }
 0x684   :  { %584 = vrot.lane.b32.xlu0 %v5041_v45, %s4776_s28 }
 0x6f2   :  { %v759_v43 = vpop.permute.xlu1 %758 }
 0x6f3   :  { %3867 = vmatmul.mubr.msk.f32.vlgmr.msra.gmra.mrb[6].mxu1 %vm165_vm2, %v759_v43 }
 0x6f4   :  { %4277 = vmatpush3.bf16.msra.mxu1 %v5001_v56  ;;  %3888 = vmatprep.mubr.msk.f32.mxu1 %vm4773_vm0, %v4774_v1 }
 0x6f5   :  { %4278 = vmatprep.subr.bf16.mxu1 %v4772_v0 }
 0x6f6   :  { %v585_v46 = vpop.permute.xlu0 %584 }
 0x6f7   :  { %588 = vst.msk [vmem:[#allocation15] sm:$0xf] %vm131_vm1, %v585_v46  ;;  %3878 = vmatmul.mubr.msk.f32.vlgmr.msra.gmra.mrb[8].mxu0 %vm165_vm2, %v585_v46 }
 0x6f8   :  { %4283 = vmatpush3.bf16.msra.mxu0 %v4934_v5  ;;  %3899 = vmatprep.mubr.msk.f32.mxu0 %vm4773_vm0, %v4774_v1 }
 0x6f9   :  { %4284 = vmatprep.subr.bf16.mxu0 %v4772_v0  ;;  %4280 = vmatpush3.bf16.msra.mxu1 %v5004_v58 }
 0x6fa   :  { %4287 = vmatprep.subr.bf16.mxu1 %v4772_v0 }
 0x6fc   :  { %4286 = vmatpush3.bf16.msra.mxu0 %v4938_v8 }
 0x6fd   :  { %4293 = vmatprep.subr.bf16.mxu0 %v4772_v0 }
 0x6ff   :  { %3900 = vmatmul.mubr.msk.f32.vlgmr.msra.gmra.mrb[10].mxu0 %vm165_vm2, %v759_v43 }
 0x700   :  { %4295 = vmatpush3.bf16.msra.mxu0 %v4961_v36  ;;  %3921 = vmatprep.mubr.msk.f32.mxu0 %vm4773_vm0, %v4774_v1 }
 0x701   :  { %4296 = vmatprep.subr.bf16.mxu0 %v4772_v0 }
 0x704   :  { %4298 = vmatpush3.bf16.msra.mxu0 %v4969_v41 }
 0x705   :  { %4305 = vmatprep.subr.bf16.mxu0 %v4772_v0 }
 0x7c6   :  { %v828_v47 = vpop.f32.mrb[6].mxu1 }
 0x7c7   :  { %v3868_v48 = vpop.f32.mrb[7].mxu1  ;;  %v829_v49 = vadd.f32 %v5012_v59, %v828_v47 }
 0x7ca   :  { %v900_v50 = vpop.f32.mrb[8].mxu0 }
 0x7cb   :  { %v904_v51 = vadd.f32 %v900_v50, %v829_v49  ;;  %v3879_v52 = vpop.f32.mrb[9].mxu0 }
 0x7cd   :  { %v3537_v53 = vmul.f32 -1.442695, %v904_v51 }
 0x7cf   :  { %4496 = vpow2.f32 %v3537_v53 }
 0x7d2   :  { %v1073_v55 = vpop.f32.mrb[10].mxu0 }
 0x7d3   :  { %v1077_v57 = vadd.f32 %v1073_v55, %v1006_v54  ;;  %v3901_v60 = vpop.f32.mrb[11].mxu0 }
 0x7d5   :  { %v3540_v61 = vmul.f32 -1.442695, %v1077_v57 }
 0x7d7   :  { %4498 = vpow2.f32 %v3540_v61 }
 0x7d9   :  { %v4497_v62 = vpop.eup %4496 }
 0x7da   :  { %v908_v63 = vadd.f32 1.0, %v4497_v62 }
 0x7dc   :  { %4500 = vrcp.f32 %v908_v63 }
 0x7e1   :  { %v4499_v2 = vpop.eup %4498 }
 0x7e2   :  { %v1081_v3 = vadd.f32 1.0, %v4499_v2 }
 0x7e4   :  { %4502 = vrcp.f32 %v1081_v3 }
 0x7e6   :  { %v4501_v4 = vpop.eup %4500 }
 0x7e7   :  { %v911_v6 = vmul.f32 %v4501_v4, %v585_v46  ;;  %v991_v22 = vsub.f32 1.0, %v4501_v4  ;;  %v997_v24 = vmul.f32 %v4501_v4, %v5041_v45 }
 0x7e9   :  { %3889 = vmatmul.mubr.msk.f32.vlgmr.msra.gmra.mrb[8].mxu1 %vm165_vm2, %v911_v6 }
 0x7ea   :  { %4289 = vmatpush3.bf16.msra.mxu1 %v4947_v13  ;;  %3910 = vmatprep.mubr.msk.f32.mxu1 %vm4773_vm0, %v4774_v1 }
 0x7eb   :  { %4290 = vmatprep.subr.bf16.mxu1 %v4772_v0 }
 0x7ee   :  { %v4503_v7 = vpop.eup %4502  ;;  %4292 = vmatpush3.bf16.msra.mxu1 %v4950_v15 }
 0x7ef   :  { %v1085_v9 = vmul.f32 %v4503_v7, %v759_v43  ;;  %4299 = vmatprep.subr.bf16.mxu1 %v4772_v0  ;;  %v1165_v27 = vsub.f32 1.0, %v4503_v7  ;;  %v1171_v29 = vmul.f32 %v4503_v7, %v5037_v38  ;;  %v1422_v38 = vld [vmem:[#allocation3 + $0xc] sm:$0xf] }
 0x7f1   :  { %3911 = vmatmul.mubr.msk.f32.vlgmr.msra.gmra.mrb[10].mxu1 %vm165_vm2, %v1085_v9 }
 0x7f2   :  { %4301 = vmatpush3.bf16.msra.mxu1 %v4959_v32  ;;  %3932 = vmatprep.mubr.msk.f32.mxu1 %vm4773_vm0, %v4774_v1 }
 0x7f3   :  { %4302 = vmatprep.subr.bf16.mxu1 %v4772_v0 }
 0x7f6   :  { %4304 = vmatpush3.bf16.msra.mxu1 %v4964_v40 }
 0x7f7   :  { %4311 = vmatprep.subr.bf16.mxu1 %v4772_v0 }
 0x8bc   :  { %v981_v10 = vpop.f32.mrb[8].mxu1 }
 0x8bd   :  { %986 = vrot.lane.b32.xlu0 %v981_v10, %s4762_s15  ;;  %v3890_v11 = vpop.f32.mrb[9].mxu1 }
 0x8c4   :  { %v1155_v12 = vpop.f32.mrb[10].mxu1 }
 0x8c5   :  { %1160 = vrot.lane.b32.xlu1 %v1155_v12, %s4762_s15  ;;  %v3912_v14 = vpop.f32.mrb[11].mxu1 }
 0x92f   :  { %v987_v16 = vpop.permute.xlu0 %986 }
 0x930   :  { %v989_v17 = vadd.f32 %v987_v16, %v829_v49 }
 0x932   :  { %4504 = vtanh.f32 %v989_v17 }
 0x937   :  { %v1161_v18 = vpop.permute.xlu1 %1160 }
 0x938   :  { %v1163_v19 = vadd.f32 %v1161_v18, %v1006_v54 }
 0x93a   :  { %4506 = vtanh.f32 %v1163_v19 }
 0x93c   :  { %v4505_v20 = vpop.eup %4504 }
 0x93d   :  { %993 = vrot.lane.b32.xlu0 %v4505_v20, %s4776_s28 }
 0x944   :  { %v4507_v21 = vpop.eup %4506 }
 0x945   :  { %1167 = vrot.lane.b32.xlu1 %v4507_v21, %s4776_s28 }
 0x9af   :  { %v994_v23 = vpop.permute.xlu0 %993 }
 0x9b0   :  { %v996_v25 = vmul.f32 %v994_v23, %v991_v22 }
 0x9b2   :  { %v5087_v26 = vadd.f32 %v997_v24, %v996_v25 }
 0x9b4   :  { %1000 = vrot.lane.b32.xlu0 %v5087_v26, %s4776_s28 }
 0x9b7   :  { %v1168_v28 = vpop.permute.xlu1 %1167 }
 0x9b8   :  { %v1170_v30 = vmul.f32 %v1168_v28, %v1165_v27  ;;  %v1838_v27 = vld [vmem:[#allocation3 + $0x10] sm:$0xf] }
 0x9ba   :  { %v5092_v31 = vadd.f32 %v1171_v29, %v1170_v30 }
 0x9bc   :  { %1174 = vrot.lane.b32.xlu1 %v5092_v31, %s4776_s28 }
 0xa26   :  { %v1001_v33 = vpop.permute.xlu0 %1000 }
 0xa27   :  { %1004 = vst.msk [vmem:[#allocation15 + $0x4] sm:$0xf] %vm131_vm1, %v1001_v33  ;;  %3933 = vmatmul.mubr.msk.f32.vlgmr.msra.gmra.mrb[12].mxu1 %vm165_vm2, %v1001_v33 }
 0xa28   :  { %4313 = vmatpush3.bf16.msra.mxu1 %v4934_v5  ;;  %3954 = vmatprep.mubr.msk.f32.mxu1 %vm4773_vm0, %v4774_v1 }
 0xa29   :  { %4314 = vmatprep.subr.bf16.mxu1 %v4772_v0 }
 0xa2c   :  { %4316 = vmatpush3.bf16.msra.mxu1 %v4938_v8 }
 0xa2d   :  { %4323 = vmatprep.subr.bf16.mxu1 %v4772_v0 }
 0xa2e   :  { %v1175_v34 = vpop.permute.xlu1 %1174 }
 0xa2f   :  { %3922 = vmatmul.mubr.msk.f32.vlgmr.msra.gmra.mrb[12].mxu0 %vm165_vm2, %v1175_v34  ;;  %3955 = vmatmul.mubr.msk.f32.vlgmr.msra.gmra.mrb[14].mxu1 %vm165_vm2, %v1175_v34 }
 0xa30   :  { %4307 = vmatpush3.bf16.msra.mxu0 %v5001_v56  ;;  %3943 = vmatprep.mubr.msk.f32.mxu0 %vm4773_vm0, %v4774_v1 }
 0xa31   :  { %4308 = vmatprep.subr.bf16.mxu0 %v4772_v0  ;;  %4325 = vmatpush3.bf16.msra.mxu1 %v4961_v36 }
 0xa32   :  { %4326 = vmatprep.subr.bf16.mxu1 %v4772_v0  ;;  %3976 = vmatprep.mubr.msk.f32.mxu1 %vm4773_vm0, %v4774_v1 }
 0xa34   :  { %4310 = vmatpush3.bf16.msra.mxu0 %v5004_v58 }
 0xa35   :  { %4317 = vmatprep.subr.bf16.mxu0 %v4772_v0  ;;  %4328 = vmatpush3.bf16.msra.mxu1 %v4969_v41 }
 0xa36   :  { %4335 = vmatprep.subr.bf16.mxu1 %v4772_v0 }
 0xafa   :  { %v1316_v35 = vpop.f32.mrb[12].mxu1 }
 0xafb   :  { %v3934_v37 = vpop.f32.mrb[13].mxu1 }
 0xb02   :  { %v1244_v39 = vpop.f32.mrb[12].mxu0  ;;  %v1489_v42 = vpop.f32.mrb[14].mxu1 }
 0xb03   :  { %v1245_v44 = vadd.f32 %v5012_v59, %v1244_v39  ;;  %v1493_v45 = vadd.f32 %v1489_v42, %v1422_v38  ;;  %v3923_v43 = vpop.f32.mrb[13].mxu0  ;;  %v3956_v46 = vpop.f32.mrb[15].mxu1 }
 0xb05   :  { %v1320_v47 = vadd.f32 %v1316_v35, %v1245_v44  ;;  %v3547_v49 = vmul.f32 -1.442695, %v1493_v45 }
 0xb07   :  { %v3544_v48 = vmul.f32 -1.442695, %v1320_v47 }
 0xb09   :  { %4508 = vpow2.f32 %v3544_v48 }
 0xb0a   :  { %4510 = vpow2.f32 %v3547_v49 }
 0xb13   :  { %v4509_v50 = vpop.eup %4508 }
 0xb14   :  { %v1324_v51 = vadd.f32 1.0, %v4509_v50  ;;  %v4511_v52 = vpop.eup %4510 }
 0xb15   :  { %v1497_v53 = vadd.f32 1.0, %v4511_v52 }
 0xb16   :  { %4512 = vrcp.f32 %v1324_v51 }
 0xb17   :  { %4514 = vrcp.f32 %v1497_v53 }
 0xb20   :  { %v4513_v54 = vpop.eup %4512 }
 0xb21   :  { %v1327_v55 = vmul.f32 %v4513_v54, %v1001_v33  ;;  %v4515_v57 = vpop.eup %4514  ;;  %v1407_v11 = vsub.f32 1.0, %v4513_v54  ;;  %v1413_v14 = vmul.f32 %v4513_v54, %v5087_v26 }
 0xb22   :  { %v1501_v60 = vmul.f32 %v4515_v57, %v1175_v34  ;;  %v1581_v18 = vsub.f32 1.0, %v4515_v57  ;;  %v1587_v20 = vmul.f32 %v4515_v57, %v5092_v31 }
 0xb23   :  { %3944 = vmatmul.mubr.msk.f32.vlgmr.msra.gmra.mrb[14].mxu0 %vm165_vm2, %v1327_v55 }
 0xb24   :  { %4319 = vmatpush3.bf16.msra.mxu0 %v4947_v13  ;;  %3965 = vmatprep.mubr.msk.f32.mxu0 %vm4773_vm0, %v4774_v1 }
 0xb25   :  { %4320 = vmatprep.subr.bf16.mxu0 %v4772_v0 }
 0xb28   :  { %4322 = vmatpush3.bf16.msra.mxu0 %v4950_v15 }
 0xb29   :  { %4329 = vmatprep.subr.bf16.mxu0 %v4772_v0 }
 0xb2b   :  { %3966 = vmatmul.mubr.msk.f32.vlgmr.msra.gmra.mrb[16].mxu0 %vm165_vm2, %v1501_v60 }
 0xb2c   :  { %4331 = vmatpush3.bf16.msra.mxu0 %v4959_v32  ;;  %3987 = vmatprep.mubr.msk.f32.mxu0 %vm4773_vm0, %v4774_v1 }
 0xb2d   :  { %4332 = vmatprep.subr.bf16.mxu0 %v4772_v0 }
 0xb30   :  { %4334 = vmatpush3.bf16.msra.mxu0 %v4964_v40 }
 0xb31   :  { %4341 = vmatprep.subr.bf16.mxu0 %v4772_v0 }
 0xbf6   :  { %v1397_v61 = vpop.f32.mrb[14].mxu0 }
 0xbf7   :  { %1402 = vrot.lane.b32.xlu0 %v1397_v61, %s4762_s15  ;;  %v3945_v62 = vpop.f32.mrb[15].mxu0 }
 0xbfe   :  { %v1571_v63 = vpop.f32.mrb[16].mxu0 }
 0xbff   :  { %1576 = vrot.lane.b32.xlu1 %v1571_v63, %s4762_s15  ;;  %v3967_v2 = vpop.f32.mrb[17].mxu0 }
 0xc69   :  { %v1403_v3 = vpop.permute.xlu0 %1402 }
 0xc6a   :  { %v1405_v4 = vadd.f32 %v1403_v3, %v1245_v44 }
 0xc6c   :  { %4516 = vtanh.f32 %v1405_v4 }
 0xc71   :  { %v1577_v6 = vpop.permute.xlu1 %1576 }
 0xc72   :  { %v1579_v7 = vadd.f32 %v1577_v6, %v1422_v38 }
 0xc74   :  { %4518 = vtanh.f32 %v1579_v7 }
 0xc76   :  { %v4517_v9 = vpop.eup %4516 }
 0xc77   :  { %1409 = vrot.lane.b32.xlu0 %v4517_v9, %s4776_s28 }
 0xc7e   :  { %v4519_v10 = vpop.eup %4518 }
 0xc7f   :  { %1583 = vrot.lane.b32.xlu1 %v4519_v10, %s4776_s28 }
 0xce9   :  { %v1410_v12 = vpop.permute.xlu0 %1409 }
 0xcea   :  { %v1412_v16 = vmul.f32 %v1410_v12, %v1407_v11 }
 0xcec   :  { %v5138_v17 = vadd.f32 %v1413_v14, %v1412_v16 }
 0xcee   :  { %1416 = vrot.lane.b32.xlu0 %v5138_v17, %s4776_s28 }
 0xcf1   :  { %v1584_v19 = vpop.permute.xlu1 %1583 }
 0xcf2   :  { %v1586_v21 = vmul.f32 %v1584_v19, %v1581_v18  ;;  %v2254_v18 = vld [vmem:[#allocation3 + $0x14] sm:$0xf] }
 0xcf4   :  { %v5143_v22 = vadd.f32 %v1587_v20, %v1586_v21 }
 0xcf6   :  { %1590 = vrot.lane.b32.xlu1 %v5143_v22, %s4776_s28 }
 0xd60   :  { %v1417_v23 = vpop.permute.xlu0 %1416 }
 0xd61   :  { %1420 = vst.msk [vmem:[#allocation15 + $0x8] sm:$0xf] %vm131_vm1, %v1417_v23  ;;  %3988 = vmatmul.mubr.msk.f32.vlgmr.msra.gmra.mrb[18].mxu0 %vm165_vm2, %v1417_v23 }
 0xd62   :  { %4343 = vmatpush3.bf16.msra.mxu0 %v4934_v5  ;;  %4009 = vmatprep.mubr.msk.f32.mxu0 %vm4773_vm0, %v4774_v1 }
 0xd63   :  { %4344 = vmatprep.subr.bf16.mxu0 %v4772_v0 }
 0xd66   :  { %4346 = vmatpush3.bf16.msra.mxu0 %v4938_v8 }
 0xd67   :  { %4353 = vmatprep.subr.bf16.mxu0 %v4772_v0 }
 0xd68   :  { %v1591_v24 = vpop.permute.xlu1 %1590 }
 0xd69   :  { %3977 = vmatmul.mubr.msk.f32.vlgmr.msra.gmra.mrb[16].mxu1 %vm165_vm2, %v1591_v24  ;;  %4010 = vmatmul.mubr.msk.f32.vlgmr.msra.gmra.mrb[20].mxu0 %vm165_vm2, %v1591_v24 }
 0xd6a   :  { %4337 = vmatpush3.bf16.msra.mxu1 %v5001_v56  ;;  %3998 = vmatprep.mubr.msk.f32.mxu1 %vm4773_vm0, %v4774_v1 }
 0xd6b   :  { %4338 = vmatprep.subr.bf16.mxu1 %v4772_v0  ;;  %4355 = vmatpush3.bf16.msra.mxu0 %v4961_v36 }
 0xd6c   :  { %4356 = vmatprep.subr.bf16.mxu0 %v4772_v0  ;;  %4031 = vmatprep.mubr.msk.f32.mxu0 %vm4773_vm0, %v4774_v1 }
 0xd6e   :  { %4340 = vmatpush3.bf16.msra.mxu1 %v5004_v58 }
 0xd6f   :  { %4347 = vmatprep.subr.bf16.mxu1 %v4772_v0  ;;  %4358 = vmatpush3.bf16.msra.mxu0 %v4969_v41 }
 0xd70   :  { %4365 = vmatprep.subr.bf16.mxu0 %v4772_v0 }
 0xe34   :  { %v1732_v25 = vpop.f32.mrb[18].mxu0 }
 0xe35   :  { %v3989_v26 = vpop.f32.mrb[19].mxu0 }
 0xe3c   :  { %v1660_v28 = vpop.f32.mrb[16].mxu1  ;;  %v1905_v29 = vpop.f32.mrb[20].mxu0 }
 0xe3d   :  { %v1661_v30 = vadd.f32 %v5012_v59, %v1660_v28  ;;  %v1909_v31 = vadd.f32 %v1905_v29, %v1838_v27  ;;  %v3978_v33 = vpop.f32.mrb[17].mxu1  ;;  %v4011_v34 = vpop.f32.mrb[21].mxu0 }
 0xe3f   :  { %v1736_v35 = vadd.f32 %v1732_v25, %v1661_v30  ;;  %v3554_v38 = vmul.f32 -1.442695, %v1909_v31 }
 0xe41   :  { %v3551_v37 = vmul.f32 -1.442695, %v1736_v35 }
 0xe43   :  { %4520 = vpow2.f32 %v3551_v37 }
 0xe44   :  { %4522 = vpow2.f32 %v3554_v38 }
 0xe4d   :  { %v4521_v39 = vpop.eup %4520 }
 0xe4e   :  { %v1740_v42 = vadd.f32 1.0, %v4521_v39  ;;  %v4523_v44 = vpop.eup %4522 }
 0xe4f   :  { %v1913_v45 = vadd.f32 1.0, %v4523_v44 }
 0xe50   :  { %4524 = vrcp.f32 %v1740_v42 }
 0xe51   :  { %4526 = vrcp.f32 %v1913_v45 }
 0xe5a   :  { %v4525_v43 = vpop.eup %4524 }
 0xe5b   :  { %v1743_v46 = vmul.f32 %v4525_v43, %v1417_v23  ;;  %v4527_v47 = vpop.eup %4526  ;;  %v1823_v62 = vsub.f32 1.0, %v4525_v43  ;;  %v1829_v2 = vmul.f32 %v4525_v43, %v5138_v17 }
 0xe5c   :  { %v1917_v48 = vmul.f32 %v4527_v47, %v1591_v24  ;;  %v1997_v6 = vsub.f32 1.0, %v4527_v47  ;;  %v2003_v9 = vmul.f32 %v4527_v47, %v5143_v22 }
 0xe5d   :  { %3999 = vmatmul.mubr.msk.f32.vlgmr.msra.gmra.mrb[18].mxu1 %vm165_vm2, %v1743_v46 }
 0xe5e   :  { %4349 = vmatpush3.bf16.msra.mxu1 %v4947_v13  ;;  %4020 = vmatprep.mubr.msk.f32.mxu1 %vm4773_vm0, %v4774_v1 }
 0xe5f   :  { %4350 = vmatprep.subr.bf16.mxu1 %v4772_v0 }
 0xe62   :  { %4352 = vmatpush3.bf16.msra.mxu1 %v4950_v15 }
 0xe63   :  { %4359 = vmatprep.subr.bf16.mxu1 %v4772_v0 }
 0xe65   :  { %4021 = vmatmul.mubr.msk.f32.vlgmr.msra.gmra.mrb[20].mxu1 %vm165_vm2, %v1917_v48 }
 0xe66   :  { %4361 = vmatpush3.bf16.msra.mxu1 %v4959_v32  ;;  %4042 = vmatprep.mubr.msk.f32.mxu1 %vm4773_vm0, %v4774_v1 }
 0xe67   :  { %4362 = vmatprep.subr.bf16.mxu1 %v4772_v0 }
 0xe6a   :  { %4364 = vmatpush3.bf16.msra.mxu1 %v4964_v40 }
 0xe6b   :  { %4371 = vmatprep.subr.bf16.mxu1 %v4772_v0 }
 0xf30   :  { %v1813_v49 = vpop.f32.mrb[18].mxu1 }
 0xf31   :  { %1818 = vrot.lane.b32.xlu0 %v1813_v49, %s4762_s15  ;;  %v4000_v50 = vpop.f32.mrb[19].mxu1 }
 0xf38   :  { %v1987_v51 = vpop.f32.mrb[20].mxu1 }
 0xf39   :  { %1992 = vrot.lane.b32.xlu1 %v1987_v51, %s4762_s15  ;;  %v4022_v52 = vpop.f32.mrb[21].mxu1 }
 0xfa3   :  { %v1819_v53 = vpop.permute.xlu0 %1818 }
 0xfa4   :  { %v1821_v54 = vadd.f32 %v1819_v53, %v1661_v30 }
 0xfa6   :  { %4528 = vtanh.f32 %v1821_v54 }
 0xfab   :  { %v1993_v55 = vpop.permute.xlu1 %1992 }
 0xfac   :  { %v1995_v57 = vadd.f32 %v1993_v55, %v1838_v27 }
 0xfae   :  { %4530 = vtanh.f32 %v1995_v57 }
 0xfb0   :  { %v4529_v60 = vpop.eup %4528 }
 0xfb1   :  { %1825 = vrot.lane.b32.xlu0 %v4529_v60, %s4776_s28 }
 0xfb8   :  { %v4531_v61 = vpop.eup %4530 }
 0xfb9   :  { %1999 = vrot.lane.b32.xlu1 %v4531_v61, %s4776_s28 }
0x1023   :  { %v1826_v63 = vpop.permute.xlu0 %1825 }
0x1024   :  { %v1828_v3 = vmul.f32 %v1826_v63, %v1823_v62 }
0x1026   :  { %v5189_v4 = vadd.f32 %v1829_v2, %v1828_v3 }
0x1028   :  { %1832 = vrot.lane.b32.xlu0 %v5189_v4, %s4776_s28 }
0x102b   :  { %v2000_v7 = vpop.permute.xlu1 %1999 }
0x102c   :  { %v2002_v10 = vmul.f32 %v2000_v7, %v1997_v6  ;;  %v2670_v6 = vld [vmem:[#allocation3 + $0x18] sm:$0xf] }
0x102e   :  { %v5194_v11 = vadd.f32 %v2003_v9, %v2002_v10 }
0x1030   :  { %2006 = vrot.lane.b32.xlu1 %v5194_v11, %s4776_s28 }
0x109a   :  { %v1833_v12 = vpop.permute.xlu0 %1832 }
0x109b   :  { %1836 = vst.msk [vmem:[#allocation15 + $0xc] sm:$0xf] %vm131_vm1, %v1833_v12  ;;  %4043 = vmatmul.mubr.msk.f32.vlgmr.msra.gmra.mrb[22].mxu1 %vm165_vm2, %v1833_v12 }
0x109c   :  { %4373 = vmatpush3.bf16.msra.mxu1 %v4934_v5  ;;  %4064 = vmatprep.mubr.msk.f32.mxu1 %vm4773_vm0, %v4774_v1 }
0x109d   :  { %4374 = vmatprep.subr.bf16.mxu1 %v4772_v0 }
0x10a0   :  { %4376 = vmatpush3.bf16.msra.mxu1 %v4938_v8 }
0x10a1   :  { %4383 = vmatprep.subr.bf16.mxu1 %v4772_v0 }
0x10a2   :  { %v2007_v14 = vpop.permute.xlu1 %2006 }
0x10a3   :  { %4032 = vmatmul.mubr.msk.f32.vlgmr.msra.gmra.mrb[22].mxu0 %vm165_vm2, %v2007_v14  ;;  %4065 = vmatmul.mubr.msk.f32.vlgmr.msra.gmra.mrb[24].mxu1 %vm165_vm2, %v2007_v14 }
0x10a4   :  { %4367 = vmatpush3.bf16.msra.mxu0 %v5001_v56  ;;  %4053 = vmatprep.mubr.msk.f32.mxu0 %vm4773_vm0, %v4774_v1 }
0x10a5   :  { %4368 = vmatprep.subr.bf16.mxu0 %v4772_v0  ;;  %4385 = vmatpush3.bf16.msra.mxu1 %v4961_v36 }
0x10a6   :  { %4386 = vmatprep.subr.bf16.mxu1 %v4772_v0  ;;  %4086 = vmatprep.mubr.msk.f32.mxu1 %vm4773_vm0, %v4774_v1 }
0x10a8   :  { %4370 = vmatpush3.bf16.msra.mxu0 %v5004_v58 }
0x10a9   :  { %4377 = vmatprep.subr.bf16.mxu0 %v4772_v0  ;;  %4388 = vmatpush3.bf16.msra.mxu1 %v4969_v41 }
0x10aa   :  { %4395 = vmatprep.subr.bf16.mxu1 %v4772_v0 }
0x116e   :  { %v2148_v16 = vpop.f32.mrb[22].mxu1 }
0x116f   :  { %v4044_v17 = vpop.f32.mrb[23].mxu1 }
0x1176   :  { %v2076_v19 = vpop.f32.mrb[22].mxu0  ;;  %v2321_v20 = vpop.f32.mrb[24].mxu1 }
0x1177   :  { %v2077_v21 = vadd.f32 %v5012_v59, %v2076_v19  ;;  %v2325_v22 = vadd.f32 %v2321_v20, %v2254_v18  ;;  %v4033_v23 = vpop.f32.mrb[23].mxu0  ;;  %v4066_v24 = vpop.f32.mrb[25].mxu1 }
0x1179   :  { %v2152_v25 = vadd.f32 %v2148_v16, %v2077_v21  ;;  %v3561_v27 = vmul.f32 -1.442695, %v2325_v22 }
0x117b   :  { %v3558_v26 = vmul.f32 -1.442695, %v2152_v25 }
0x117d   :  { %4532 = vpow2.f32 %v3558_v26 }
0x117e   :  { %4534 = vpow2.f32 %v3561_v27 }
0x1187   :  { %v4533_v28 = vpop.eup %4532 }
0x1188   :  { %v2156_v29 = vadd.f32 1.0, %v4533_v28  ;;  %v4535_v30 = vpop.eup %4534 }
0x1189   :  { %v2329_v31 = vadd.f32 1.0, %v4535_v30 }
0x118a   :  { %4536 = vrcp.f32 %v2156_v29 }
0x118b   :  { %4538 = vrcp.f32 %v2329_v31 }
0x1194   :  { %v4537_v33 = vpop.eup %4536 }
0x1195   :  { %v2159_v34 = vmul.f32 %v4537_v33, %v1833_v12  ;;  %v4539_v35 = vpop.eup %4538  ;;  %v2239_v50 = vsub.f32 1.0, %v4537_v33  ;;  %v2245_v52 = vmul.f32 %v4537_v33, %v5189_v4 }
0x1196   :  { %v2333_v37 = vmul.f32 %v4539_v35, %v2007_v14  ;;  %v2413_v55 = vsub.f32 1.0, %v4539_v35  ;;  %v2419_v60 = vmul.f32 %v4539_v35, %v5194_v11 }
0x1197   :  { %4054 = vmatmul.mubr.msk.f32.vlgmr.msra.gmra.mrb[24].mxu0 %vm165_vm2, %v2159_v34 }
0x1198   :  { %4379 = vmatpush3.bf16.msra.mxu0 %v4947_v13  ;;  %4075 = vmatprep.mubr.msk.f32.mxu0 %vm4773_vm0, %v4774_v1 }
0x1199   :  { %4380 = vmatprep.subr.bf16.mxu0 %v4772_v0 }
0x119c   :  { %4382 = vmatpush3.bf16.msra.mxu0 %v4950_v15 }
0x119d   :  { %4389 = vmatprep.subr.bf16.mxu0 %v4772_v0 }
0x119f   :  { %4076 = vmatmul.mubr.msk.f32.vlgmr.msra.gmra.mrb[26].mxu0 %vm165_vm2, %v2333_v37 }
0x11a0   :  { %4391 = vmatpush3.bf16.msra.mxu0 %v4959_v32  ;;  %4097 = vmatprep.mubr.msk.f32.mxu0 %vm4773_vm0, %v4774_v1 }
0x11a1   :  { %4392 = vmatprep.subr.bf16.mxu0 %v4772_v0 }
0x11a4   :  { %4394 = vmatpush3.bf16.msra.mxu0 %v4964_v40 }
0x11a5   :  { %4401 = vmatprep.subr.bf16.mxu0 %v4772_v0 }
0x126a   :  { %v2229_v38 = vpop.f32.mrb[24].mxu0 }
0x126b   :  { %2234 = vrot.lane.b32.xlu0 %v2229_v38, %s4762_s15  ;;  %v4055_v39 = vpop.f32.mrb[25].mxu0 }
0x1272   :  { %v2403_v42 = vpop.f32.mrb[26].mxu0 }
0x1273   :  { %2408 = vrot.lane.b32.xlu1 %v2403_v42, %s4762_s15  ;;  %v4077_v44 = vpop.f32.mrb[27].mxu0 }
0x12dd   :  { %v2235_v45 = vpop.permute.xlu0 %2234 }
0x12de   :  { %v2237_v43 = vadd.f32 %v2235_v45, %v2077_v21 }
0x12e0   :  { %4540 = vtanh.f32 %v2237_v43 }
0x12e5   :  { %v2409_v46 = vpop.permute.xlu1 %2408 }
0x12e6   :  { %v2411_v47 = vadd.f32 %v2409_v46, %v2254_v18 }
0x12e8   :  { %4542 = vtanh.f32 %v2411_v47 }
0x12ea   :  { %v4541_v48 = vpop.eup %4540 }
0x12eb   :  { %2241 = vrot.lane.b32.xlu0 %v4541_v48, %s4776_s28 }
0x12f2   :  { %v4543_v49 = vpop.eup %4542 }
0x12f3   :  { %2415 = vrot.lane.b32.xlu1 %v4543_v49, %s4776_s28 }
0x135d   :  { %v2242_v51 = vpop.permute.xlu0 %2241 }
0x135e   :  { %v2244_v53 = vmul.f32 %v2242_v51, %v2239_v50 }
0x1360   :  { %v5240_v54 = vadd.f32 %v2245_v52, %v2244_v53  ;;  %v3086_v52 = vld [vmem:[#allocation3 + $0x1c] sm:$0xf] }
0x1362   :  { %2248 = vrot.lane.b32.xlu0 %v5240_v54, %s4776_s28 }
0x1365   :  { %v2416_v57 = vpop.permute.xlu1 %2415 }
0x1366   :  { %v2418_v61 = vmul.f32 %v2416_v57, %v2413_v55 }
0x1368   :  { %v5245_v62 = vadd.f32 %v2419_v60, %v2418_v61 }
0x136a   :  { %2422 = vrot.lane.b32.xlu1 %v5245_v62, %s4776_s28 }
0x13d4   :  { %v2249_v63 = vpop.permute.xlu0 %2248 }
0x13d5   :  { %2252 = vst.msk [vmem:[#allocation15 + $0x10] sm:$0xf] %vm131_vm1, %v2249_v63  ;;  %4098 = vmatmul.mubr.msk.f32.vlgmr.msra.gmra.mrb[28].mxu0 %vm165_vm2, %v2249_v63 }
0x13d6   :  { %4403 = vmatpush3.bf16.msra.mxu0 %v4934_v5  ;;  %4119 = vmatprep.mubr.msk.f32.mxu0 %vm4773_vm0, %v4774_v1 }
0x13d7   :  { %4404 = vmatprep.subr.bf16.mxu0 %v4772_v0 }
0x13da   :  { %4406 = vmatpush3.bf16.msra.mxu0 %v4938_v8 }
0x13db   :  { %4413 = vmatprep.subr.bf16.mxu0 %v4772_v0 }
0x13dc   :  { %v2423_v2 = vpop.permute.xlu1 %2422 }
0x13dd   :  { %4087 = vmatmul.mubr.msk.f32.vlgmr.msra.gmra.mrb[26].mxu1 %vm165_vm2, %v2423_v2  ;;  %4120 = vmatmul.mubr.msk.f32.vlgmr.msra.gmra.mrb[30].mxu0 %vm165_vm2, %v2423_v2 }
0x13de   :  { %4397 = vmatpush3.bf16.msra.mxu1 %v5001_v56  ;;  %4108 = vmatprep.mubr.msk.f32.mxu1 %vm4773_vm0, %v4774_v1 }
0x13df   :  { %4398 = vmatprep.subr.bf16.mxu1 %v4772_v0  ;;  %4415 = vmatpush3.bf16.msra.mxu0 %v4961_v36 }
0x13e0   :  { %4416 = vmatprep.subr.bf16.mxu0 %v4772_v0  ;;  %4141 = vmatprep.mubr.msk.f32.mxu0 %vm4773_vm0, %v4774_v1 }
0x13e2   :  { %4400 = vmatpush3.bf16.msra.mxu1 %v5004_v58 }
0x13e3   :  { %4407 = vmatprep.subr.bf16.mxu1 %v4772_v0  ;;  %4418 = vmatpush3.bf16.msra.mxu0 %v4969_v41 }
0x13e4   :  { %4425 = vmatprep.subr.bf16.mxu0 %v4772_v0 }
0x14a8   :  { %v2564_v3 = vpop.f32.mrb[28].mxu0 }
0x14a9   :  { %v4099_v4 = vpop.f32.mrb[29].mxu0 }
0x14b0   :  { %v2492_v7 = vpop.f32.mrb[26].mxu1  ;;  %v2737_v9 = vpop.f32.mrb[30].mxu0 }
0x14b1   :  { %v2493_v10 = vadd.f32 %v5012_v59, %v2492_v7  ;;  %v2741_v11 = vadd.f32 %v2737_v9, %v2670_v6  ;;  %v4088_v12 = vpop.f32.mrb[27].mxu1  ;;  %v4121_v14 = vpop.f32.mrb[31].mxu0 }
0x14b3   :  { %v2568_v16 = vadd.f32 %v2564_v3, %v2493_v10  ;;  %v3568_v18 = vmul.f32 -1.442695, %v2741_v11 }
0x14b5   :  { %v3565_v17 = vmul.f32 -1.442695, %v2568_v16 }
0x14b7   :  { %4544 = vpow2.f32 %v3565_v17 }
0x14b8   :  { %4546 = vpow2.f32 %v3568_v18 }
0x14c1   :  { %v4545_v19 = vpop.eup %4544 }
0x14c2   :  { %v2572_v20 = vadd.f32 1.0, %v4545_v19  ;;  %v4547_v21 = vpop.eup %4546 }
0x14c3   :  { %v2745_v22 = vadd.f32 1.0, %v4547_v21 }
0x14c4   :  { %4548 = vrcp.f32 %v2572_v20 }
0x14c5   :  { %4550 = vrcp.f32 %v2745_v22 }
0x14ce   :  { %v4549_v23 = vpop.eup %4548 }
0x14cf   :  { %v2575_v24 = vmul.f32 %v4549_v23, %v2249_v63  ;;  %v4551_v59 = vpop.eup %4550  ;;  %v2655_v38 = vsub.f32 1.0, %v4549_v23  ;;  %v2661_v42 = vmul.f32 %v4549_v23, %v5240_v54 }
0x14d0   :  { %v2749_v25 = vmul.f32 %v4551_v59, %v2423_v2  ;;  %v2829_v43 = vsub.f32 1.0, %v4551_v59  ;;  %v2835_v47 = vmul.f32 %v4551_v59, %v5245_v62 }
0x14d1   :  { %4109 = vmatmul.mubr.msk.f32.vlgmr.msra.gmra.mrb[28].mxu1 %vm165_vm2, %v2575_v24 }
0x14d2   :  { %4409 = vmatpush3.bf16.msra.mxu1 %v4947_v13  ;;  %4130 = vmatprep.mubr.msk.f32.mxu1 %vm4773_vm0, %v4774_v1 }
0x14d3   :  { %4410 = vmatprep.subr.bf16.mxu1 %v4772_v0 }
0x14d6   :  { %4412 = vmatpush3.bf16.msra.mxu1 %v4950_v15 }
0x14d7   :  { %4419 = vmatprep.subr.bf16.mxu1 %v4772_v0 }
0x14d9   :  { %4131 = vmatmul.mubr.msk.f32.vlgmr.msra.gmra.mrb[30].mxu1 %vm165_vm2, %v2749_v25 }
0x14da   :  { %4421 = vmatpush3.bf16.msra.mxu1 %v4959_v32  ;;  %4152 = vmatprep.mubr.msk.f32.mxu1 %vm4773_vm0, %v4774_v1 }
0x14db   :  { %4422 = vmatprep.subr.bf16.mxu1 %v4772_v0 }
0x14de   :  { %4424 = vmatpush3.bf16.msra.mxu1 %v4964_v40 }
0x14df   :  { %4431 = vmatprep.subr.bf16.mxu1 %v4772_v0 }
0x15a4   :  { %v2645_v26 = vpop.f32.mrb[28].mxu1 }
0x15a5   :  { %2650 = vrot.lane.b32.xlu0 %v2645_v26, %s4762_s15  ;;  %v4110_v27 = vpop.f32.mrb[29].mxu1 }
0x15ac   :  { %v2819_v28 = vpop.f32.mrb[30].mxu1 }
0x15ad   :  { %2824 = vrot.lane.b32.xlu1 %v2819_v28, %s4762_s15  ;;  %v4132_v29 = vpop.f32.mrb[31].mxu1 }
0x1617   :  { %v2651_v30 = vpop.permute.xlu0 %2650 }
0x1618   :  { %v2653_v31 = vadd.f32 %v2651_v30, %v2493_v10 }
0x161a   :  { %4552 = vtanh.f32 %v2653_v31 }
0x161f   :  { %v2825_v33 = vpop.permute.xlu1 %2824 }
0x1620   :  { %v2827_v34 = vadd.f32 %v2825_v33, %v2670_v6 }
0x1622   :  { %4554 = vtanh.f32 %v2827_v34 }
0x1624   :  { %v4553_v35 = vpop.eup %4552 }
0x1625   :  { %2657 = vrot.lane.b32.xlu0 %v4553_v35, %s4776_s28 }
0x162c   :  { %v4555_v37 = vpop.eup %4554 }
0x162d   :  { %2831 = vrot.lane.b32.xlu1 %v4555_v37, %s4776_s28 }
0x1697   :  { %v2658_v39 = vpop.permute.xlu0 %2657 }
0x1698   :  { %v2660_v44 = vmul.f32 %v2658_v39, %v2655_v38 }
0x169a   :  { %v5291_v45 = vadd.f32 %v2661_v42, %v2660_v44 }
0x169c   :  { %2664 = vrot.lane.b32.xlu0 %v5291_v45, %s4776_s28 }
0x169f   :  { %v2832_v46 = vpop.permute.xlu1 %2831 }
0x16a0   :  { %v2834_v48 = vmul.f32 %v2832_v46, %v2829_v43 }
0x16a2   :  { %v5296_v49 = vadd.f32 %v2835_v47, %v2834_v48 }
0x16a4   :  { %2838 = vrot.lane.b32.xlu1 %v5296_v49, %s4776_s28 }
0x170e   :  { %v2665_v50 = vpop.permute.xlu0 %2664 }
0x170f   :  { %2668 = vst.msk [vmem:[#allocation15 + $0x14] sm:$0xf] %vm131_vm1, %v2665_v50  ;;  %4153 = vmatmul.mubr.msk.f32.vlgmr.msra.gmra.mrb[32].mxu1 %vm165_vm2, %v2665_v50 }
0x1710   :  { %4433 = vmatpush3.bf16.msra.mxu1 %v4934_v5  ;;  %4174 = vmatprep.mubr.msk.f32.mxu1 %vm4773_vm0, %v4774_v1 }
0x1711   :  { %4434 = vmatprep.subr.bf16.mxu1 %v4772_v0 }
0x1714   :  { %4436 = vmatpush3.bf16.msra.mxu1 %v4938_v8 }
0x1715   :  { %4443 = vmatprep.subr.bf16.mxu1 %v4772_v0 }
0x1716   :  { %v2839_v51 = vpop.permute.xlu1 %2838 }
0x1717   :  { %4142 = vmatmul.mubr.msk.f32.vlgmr.msra.gmra.mrb[32].mxu0 %vm165_vm2, %v2839_v51  ;;  %4175 = vmatmul.mubr.msk.f32.vlgmr.msra.gmra.mrb[34].mxu1 %vm165_vm2, %v2839_v51 }
0x1718   :  { %4427 = vmatpush3.bf16.msra.mxu0 %v5001_v56  ;;  %4163 = vmatprep.mubr.msk.f32.mxu0 %vm4773_vm0, %v4774_v1 }
0x1719   :  { %4428 = vmatprep.subr.bf16.mxu0 %v4772_v0  ;;  %4445 = vmatpush3.bf16.msra.mxu1 %v4961_v36  ;;  %v5325_v36 = vld [vmem:[%s5385_s5] ss:$0 sm:$0xff]  ;;  %s4777_s5 = smov [#allocation15]  }
0x171a   :  { %4446 = vmatprep.subr.bf16.mxu1 %v4772_v0  ;;  %4196 = vmatprep.mubr.msk.f32.mxu1 %vm4773_vm0, %v4774_v1  ;;  %s3509_s1 = sshll.u32 %s4777_s5, 4  ;;  %s3510_s1 = int_to_ptr.vmem [resolvable:$true] %s3509_s1 }
0x171b   :  { %s4729_s10 = scalar_lea.vmem %s3510_s1, 512  ;;  %p4734_p1 = scmp.lt.s32.totalorder %s3510_s1, %s3510_s1 }
0x171c   :  { %4430 = vmatpush3.bf16.msra.mxu0 %v5004_v58  ;;  %p4730_p0 = scmp.ne.s32.totalorder %s3510_s1, %s4729_s10  ;;  %p4735_p2 = scmp.lt.s32.totalorder %s4729_s10, %s4729_s10 }
0x171d   :  { %4437 = vmatprep.subr.bf16.mxu0 %v4772_v0  ;;  %4448 = vmatpush3.bf16.msra.mxu1 %v4969_v41 }
0x171e   :  { %4455 = vmatprep.subr.bf16.mxu1 %v4772_v0  ;;  %p4736_p3 = por %p4735_p2, %p4734_p1 }
0x1720   :  { %p4737_p4 = pnand %p4736_p3, %p4730_p0 }
0x17e2   :  { %v2980_v5 = vpop.f32.mrb[32].mxu1 }
0x17e3   :  { %v4154_v8 = vpop.f32.mrb[33].mxu1 }
0x17ea   :  { %v2908_v53 = vpop.f32.mrb[32].mxu0  ;;  %v3153_v54 = vpop.f32.mrb[34].mxu1 }
0x17eb   :  { %v2909_v55 = vadd.f32 %v5325_v36, %v2908_v53  ;;  %v3157_v57 = vadd.f32 %v3153_v54, %v3086_v52  ;;  %v4143_v60 = vpop.f32.mrb[33].mxu0  ;;  %v4176_v61 = vpop.f32.mrb[35].mxu1 }
0x17ed   :  { %v2984_v62 = vadd.f32 %v2980_v5, %v2909_v55  ;;  %v3575_v41 = vmul.f32 -1.442695, %v3157_v57 }
0x17ef   :  { %v3572_v63 = vmul.f32 -1.442695, %v2984_v62 }
0x17f1   :  { %4556 = vpow2.f32 %v3572_v63 }
0x17f2   :  { %4558 = vpow2.f32 %v3575_v41 }
0x17fb   :  { %v4557_v2 = vpop.eup %4556 }
0x17fc   :  { %v2988_v3 = vadd.f32 1.0, %v4557_v2  ;;  %v4559_v4 = vpop.eup %4558 }
0x17fd   :  { %v3161_v6 = vadd.f32 1.0, %v4559_v4 }
0x17fe   :  { %4560 = vrcp.f32 %v2988_v3 }
0x17ff   :  { %4562 = vrcp.f32 %v3161_v6 }
0x1808   :  { %v4561_v7 = vpop.eup %4560 }
0x1809   :  { %v2991_v9 = vmul.f32 %v4561_v7, %v2665_v50  ;;  %v4563_v10 = vpop.eup %4562  ;;  %v3077_v22 = vmul.f32 %v4561_v7, %v5291_v45 }
0x180a   :  { %v3165_v11 = vmul.f32 %v4563_v10, %v2839_v51  ;;  %v3245_v59 = vsub.f32 1.0, %v4563_v10  ;;  %v3251_v26 = vmul.f32 %v4563_v10, %v5296_v49 }
0x180b   :  { %4164 = vmatmul.mubr.msk.f32.vlgmr.msra.gmra.mrb[34].mxu0 %vm165_vm2, %v2991_v9 }
0x180c   :  { %4439 = vmatpush3.bf16.msra.mxu0 %v4947_v13  ;;  %4185 = vmatprep.mubr.msk.f32.mxu0 %vm4773_vm0, %v4774_v1 }
0x180d   :  { %4440 = vmatprep.subr.bf16.mxu0 %v4772_v0 }
0x1810   :  { %4442 = vmatpush3.bf16.msra.mxu0 %v4950_v15 }
0x1811   :  { %4449 = vmatprep.subr.bf16.mxu0 %v4772_v0 }
0x1813   :  { %4186 = vmatmul.mubr.msk.f32.vlgmr.msra.gmra.mrb[36].mxu0 %vm165_vm2, %v3165_v11 }
0x1814   :  { %4451 = vmatpush3.bf16.msra.mxu0 %v4959_v32  ;;  %4207 = vmatprep.mubr.msk.f32.mxu0 %vm4773_vm0, %v4774_v1 }
0x1815   :  { %4452 = vmatprep.subr.bf16.mxu0 %v4772_v0 }
0x1818   :  { %4454 = vmatpush3.bf16.msra.mxu0 %v4964_v40  ;;  %v3071_v40 = vsub.f32 1.0, %v4561_v7 }
0x18de   :  { %v3061_v13 = vpop.f32.mrb[34].mxu0 }
0x18df   :  { %3066 = vrot.lane.b32.xlu0 %v3061_v13, %s4762_s15  ;;  %v4165_v12 = vpop.f32.mrb[35].mxu0 }
0x18e6   :  { %v3235_v14 = vpop.f32.mrb[36].mxu0 }
0x18e7   :  { %3240 = vrot.lane.b32.xlu1 %v3235_v14, %s4762_s15  ;;  %v4187_v15 = vpop.f32.mrb[37].mxu0 }
0x1951   :  { %v3067_v16 = vpop.permute.xlu0 %3066 }
0x1952   :  { %v3069_v17 = vadd.f32 %v3067_v16, %v2909_v55 }
0x1954   :  { %4564 = vtanh.f32 %v3069_v17 }
0x1959   :  { %v3241_v18 = vpop.permute.xlu1 %3240 }
0x195a   :  { %v3243_v32 = vadd.f32 %v3241_v18, %v3086_v52 }
0x195c   :  { %4566 = vtanh.f32 %v3243_v32 }
0x195e   :  { %v4565_v19 = vpop.eup %4564 }
0x195f   :  { %3073 = vrot.lane.b32.xlu0 %v4565_v19, %s4776_s28 }
0x1966   :  { %v4567_v20 = vpop.eup %4566 }
0x1967   :  { %3247 = vrot.lane.b32.xlu1 %v4567_v20, %s4776_s28 }
0x19d1   :  { %v3074_v21 = vpop.permute.xlu0 %3073 }
0x19d2   :  { %v3076_v23 = vmul.f32 %v3074_v21, %v3071_v40 }
0x19d4   :  { %v3078_v24 = vadd.f32 %v3077_v22, %v3076_v23 }
0x19d6   :  { %3080 = vrot.lane.b32.xlu0 %v3078_v24, %s4776_s28 }
0x19d9   :  { %v3248_v25 = vpop.permute.xlu1 %3247 }
0x19da   :  { %v3250_v27 = vmul.f32 %v3248_v25, %v3245_v59 }
0x19dc   :  { %v3252_v28 = vadd.f32 %v3251_v26, %v3250_v27 }
0x19de   :  { %3254 = vrot.lane.b32.xlu1 %v3252_v28, %s4776_s28 }
0x1a48   :  { %v3081_v29 = vpop.permute.xlu0 %3080 }
0x1a49   :  { %3084 = vst.msk [vmem:[#allocation15 + $0x18] sm:$0xf] %vm131_vm1, %v3081_v29  ;;  %4208 = vmatmul.mubr.msk.f32.vlgmr.msra.gmra.mrb[38].mxu0 %vm165_vm2, %v3081_v29 }
0x1a50   :  { %v3255_v30 = vpop.permute.xlu1 %3254 }
0x1a51   :  { %3502 = vst.msk [vmem:[#allocation2] sm:$0xf] %vm131_vm1, %v3255_v30  ;;  %4197 = vmatmul.mubr.msk.f32.vlgmr.msra.gmra.mrb[36].mxu1 %vm165_vm2, %v3255_v30 }
0x1a52   :  { %4457 = vmatpush3.bf16.msra.mxu1 %v5001_v56  ;;  %4218 = vmatprep.mubr.msk.f32.mxu1 %vm4773_vm0, %v4774_v1 }
0x1a53   :  { %4458 = vmatprep.subr.bf16.mxu1 %v4772_v0 }
0x1a56   :  { %4460 = vmatpush3.bf16.msra.mxu1 %v5004_v58 }
0x1b1c   :  { %v3396_v31 = vpop.f32.mrb[38].mxu0 }
0x1b1d   :  { %v4209_v33 = vpop.f32.mrb[39].mxu0 }
0x1b24   :  { %v3324_v34 = vpop.f32.mrb[36].mxu1 }
0x1b25   :  { %v3325_v35 = vadd.f32 %v5325_v36, %v3324_v34  ;;  %v4198_v37 = vpop.f32.mrb[37].mxu1 }
0x1b27   :  { %v3400_v38 = vadd.f32 %v3396_v31, %v3325_v35 }
0x1b29   :  { %v3579_v39 = vmul.f32 -1.442695, %v3400_v38 }
0x1b2b   :  { %4568 = vpow2.f32 %v3579_v39 }
0x1b35   :  { %v4569_v42 = vpop.eup %4568 }
0x1b36   :  { %v3404_v44 = vadd.f32 1.0, %v4569_v42 }
0x1b38   :  { %4570 = vrcp.f32 %v3404_v44 }
0x1b42   :  { %v4571_v56 = vpop.eup %4570 }
0x1b43   :  { %v3407_v45 = vmul.f32 %v4571_v56, %v3081_v29  ;;  %v3487_v47 = vsub.f32 1.0, %v4571_v56  ;;  %v3493_v49 = vmul.f32 %v4571_v56, %v3078_v24 }
0x1b45   :  { %4219 = vmatmul.mubr.msk.f32.vlgmr.msra.gmra.mrb[38].mxu1 %vm165_vm2, %v3407_v45 }
0x1c18   :  { %v3477_v1 = vpop.f32.mrb[38].mxu1 }
0x1c19   :  { %3482 = vrot.lane.b32.xlu1 %v3477_v1, %s4762_s15  ;;  %v4220_v0 = vpop.f32.mrb[39].mxu1 }
0x1c8b   :  { %v3483_v58 = vpop.permute.xlu1 %3482 }
0x1c8c   :  { %v3485_v43 = vadd.f32 %v3483_v58, %v3325_v35 }
0x1c8e   :  { %4572 = vtanh.f32 %v3485_v43 }
0x1c98   :  { %v4573_v46 = vpop.eup %4572 }
0x1c99   :  { %3489 = vrot.lane.b32.xlu0 %v4573_v46, %s4776_s28 }
0x1d0b   :  { %v3490_v48 = vpop.permute.xlu0 %3489 }
0x1d0c   :  { %v3492_v50 = vmul.f32 %v3490_v48, %v3487_v47 }
0x1d0e   :  { %v3494_v51 = vadd.f32 %v3493_v49, %v3492_v50 }
0x1d10   :  { %3496 = vrot.lane.b32.xlu1 %v3494_v51, %s4776_s28 }
0x1d82   :  { %v3497_v5 = vpop.permute.xlu1 %3496 }
0x1d83   :  { %3500 = vst.msk [vmem:[#allocation15 + $0x1c] sm:$0xf] %vm131_vm1, %v3497_v5  ;;  %3503 = vst.msk [vmem:[#allocation2 + $0x4] sm:$0xf] %vm131_vm1, %v3497_v5 }
0x1d84   :  { %4740 = shalt.err (!%p4737_p4)
}
0x1d85   :  { %s4741_s13 = scalar_lea.hbm %s5388_s8, 512 }
0x1d86   :  { %p4742_p5 = scmp.ne.s32.totalorder %s5388_s8, %s4741_s13  ;;  %p4745_p6 = scmp.lt.u32.totalorder %s4741_s13, %s5388_s8 }
0x1d88   :  { %p4747_p7 = pnand %p4745_p6, %p4742_p5 }
0x1d8a   :  { %4750 = shalt.err (!%p4747_p7)
}
0x1d8b   :  { %3515 = dma.vmem_to_hbm [thread:$0]  %s3510_s1, 512, %s5388_s8, [#allocation5], %s4762_s15, %s4762_s15, %s4763_s16  }
0x1d8c   :  { %4759 = dma.done.wait [#allocation5], 512  }
0x1d8d   :  { %4760 = vsyncadd [#allocation5], 4294966784 }
0x1d8e   :  { %3519 = vsyncpa [#allocation4], 1 }
0x1d8f   :  { %3520 = vsyncpa [#allocation7], 1 }
0x1d90   :  { %3521 = vsyncpa [#allocation10], 1 }
0x1d91   :  { %3522 = vsyncpa [#allocation13], 1 }
0x1d92   :  { %3523 = vsyncpa [#allocation5], 1 }

</bundles_post_ra>
